<compile_context>
chip_gen: v7x
topology: tpu7x:2x2x1
jax: 0.10.0
libtpu: 0.0.40
codegen_flags: <defaults>
</compile_context>

<pallas_src>
import functools

import jax
import jax.numpy as jnp
from jax import lax
from jax.experimental import pallas as pl
from jax.experimental.pallas import tpu as pltpu


# --------------------------------------------------------------------------- #
# Kernel
# --------------------------------------------------------------------------- #
def _conv2demod_kernel(x_ref, wmod_ref, bvec_ref, noise_ref, out_ref, patches_ref,
                       *, k, wp, cin, tile):
    """One (batch, spatial-tile) grid step.

    x_ref:       (1, Lp, cin)    flattened, spatially padded image (channels-last,
                                 mxu_dtype); constant block index along the tile
                                 axis -> fetched from HBM once per batch.
    wmod_ref:    (1, kc, cout)   modulated + demodulated weight (hoisted, mxu_dtype).
    bvec_ref:    (1, cout)       noise gain B (f32).
    noise_ref:   (1, tile, 1)    per-position noise (f32).
    out_ref:     (1, tile, cout) output tile.
    patches_ref: (tile, kc)      VMEM scratch holding this tile's im2col block.
    """
    q0 = pl.program_id(1) * tile
    # Build the (tile, k*k*cin) patch block: each tap (dy, dx) is a *contiguous*
    # slice of the flattened padded image (virtual-width trick) -> k*k dynamic
    # sublane loads into the scratch, no reshapes / gathers, no HBM im2col.
    for t in range(k * k):
        dy, dx = divmod(t, k)
        patches_ref[:, t * cin:(t + 1) * cin] = (
            x_ref[0, pl.ds(q0 + dy * wp + dx, tile), :])
    # Single MXU matmul over the whole contraction (taps folded into K), f32 acc.
    acc = jnp.dot(patches_ref[...], wmod_ref[0],
                  preferred_element_type=jnp.float32)            # (tile, cout)
    # Epilogue (all f32): + B * noise, cast to requested output dtype.
    out = acc + noise_ref[0] * bvec_ref[...]
    out_ref[0] = out.astype(out_ref.dtype)


# --------------------------------------------------------------------------- #
# Generation-aware tiling / VMEM helpers
# --------------------------------------------------------------------------- #
def _vmem_budget_bytes():
    """~3/4 of physical VMEM (≈48 MiB on v7x's 64 MiB, ≈96 MiB on v5e/v6e's 128 MiB)."""
    try:
        cap = int(pltpu.get_tpu_info().vmem_capacity_bytes)
    except Exception:
        cap = 64 * 1024 * 1024          # conservative (v7x-sized) fallback
    return (cap * 3) // 4


def _pick_tile(lv, b, fixed_bytes, per_elem_bytes, budget, max_tile, min_grid=4):
    """Largest divisor of lv that fits the VMEM budget, is sublane-aligned and
    (when possible) leaves >= min_grid grid points for pipelining / megacore."""
    divisors = [d for d in range(1, lv + 1) if lv % d == 0]

    def ok(d, need_grid):
        if d != lv and d % 8 != 0:                       # keep (8, .)-aligned blocks
            return False
        if d > max_tile:
            return False
        if fixed_bytes + per_elem_bytes * d > budget:
            return False
        if need_grid and b * (lv // d) < min_grid:
            return False
        return True

    for need_grid in (True, False):
        cands = [d for d in divisors if ok(d, need_grid)]
        if cands:
            return max(cands)
    # TODO(synk): if even the smallest aligned tile blows the budget (huge images),
    # fall back to a halo'd manual-DMA row pipeline instead of a resident image.
    aligned = [d for d in divisors if d % 8 == 0] or [lv]
    return min(aligned)


# --------------------------------------------------------------------------- #
# Wrapper
# --------------------------------------------------------------------------- #
def conv2demod(img, ws, weight, A_w, A_b, B, noise, *, eps=1e-8,
               mxu_dtype=jnp.bfloat16, out_dtype=jnp.float32, max_tile=4096):
    b, cin, H, W = img.shape
    cout, cin2, k, k2 = weight.shape
    assert cin2 == cin and k == k2 and k % 2 == 1        # stride=1, padding='same'
    p = k // 2
    wp = W + 2 * p                                       # padded ("virtual") width
    lv = H * wp                                          # flattened virtual-output length
    lp = -(-((H + 2 * p) * wp + 2 * p) // 8) * 8         # padded-input length (+ tap slack)
    kc = k * k * cin

    # ---- hoisted style / demod math (exactly the reference weight path, f32) ----
    styles = (ws @ A_w.T + A_b).astype(jnp.float32)                          # (b, cin)
    w = weight[None].astype(jnp.float32) * styles[:, None, :, None, None]    # (b,cout,cin,k,k)
    dcoefs = lax.rsqrt(jnp.sum(jnp.square(w), axis=(2, 3, 4)) + eps)         # (b, cout)
    w = w * dcoefs[:, :, None, None, None]
    # tap-major / cin-inner rows, cout in lanes: (b, kh, kw, cin, cout) -> (b, kc, cout)
    wmod = jnp.transpose(w, (0, 3, 4, 2, 1)).reshape(b, kc, cout).astype(mxu_dtype)

    # ---- channels-last, padded, flattened image (read ~once from HBM; no im2col) ----
    x = jnp.transpose(img, (0, 2, 3, 1)).astype(jnp.float32)                 # (b,H,W,cin)
    x = jnp.pad(x, ((0, 0), (p, p), (p, p), (0, 0)))                         # (b,H+2p,wp,cin)
    x = x.reshape(b, (H + 2 * p) * wp, cin)
    x = jnp.pad(x, ((0, 0), (0, lp - x.shape[1]), (0, 0))).astype(mxu_dtype) # (b,lp,cin)

    noise_f = jnp.pad(noise.astype(jnp.float32).reshape(b, H, W, 1),
                      ((0, 0), (0, 0), (0, 2 * p), (0, 0))).reshape(b, lv, 1)
    bvec = B.reshape(1, cout).astype(jnp.float32)

    # ---- VMEM budget -> spatial tile ----
    mxu_bytes = jnp.dtype(mxu_dtype).itemsize
    out_bytes = jnp.dtype(out_dtype).itemsize
    budget = _vmem_budget_bytes()
    fixed = (2 * lp * cin * mxu_bytes            # per-batch resident image (double-buffered)
             + 2 * kc * cout * mxu_bytes         # modulated weight
             + 2 * cout * 4)                     # B
    per_elem = (kc * mxu_bytes                   # patch scratch
                + 2 * 4                          # noise (double-buffered)
                + 2 * cout * out_bytes           # output (double-buffered)
                + cin * mxu_bytes + 2 * cout * 4)  # live values (slab / acc / epilogue)
    tile = _pick_tile(lv, b, fixed, per_elem, budget, max_tile)
    n_t = lv // tile

    kernel = functools.partial(_conv2demod_kernel, k=k, wp=wp, cin=cin, tile=tile)
    out = pl.pallas_call(
        kernel,
        out_shape=jax.ShapeDtypeStruct((b, lv, cout), out_dtype),
        grid_spec=pltpu.PrefetchScalarGridSpec(
            num_scalar_prefetch=0,
            grid=(b, n_t),
            in_specs=[
                # padded flattened image: constant along the tile axis (1 HBM read / batch)
                pl.BlockSpec((1, lp, cin), lambda ib, it: (ib, 0, 0)),
                # modulated + demodulated weight (per batch)
                pl.BlockSpec((1, kc, cout), lambda ib, it: (ib, 0, 0)),
                # noise gain B (constant)
                pl.BlockSpec((1, cout), lambda ib, it: (0, 0)),
                # per (batch, tile) noise
                pl.BlockSpec((1, tile, 1), lambda ib, it: (ib, it, 0)),
            ],
            out_specs=pl.BlockSpec((1, tile, cout), lambda ib, it: (ib, it, 0)),
            scratch_shapes=[pltpu.VMEM((tile, kc), mxu_dtype)],
        ),
        compiler_params=pltpu.CompilerParams(
            dimension_semantics=("parallel", "parallel"),
            vmem_limit_bytes=int(budget),
        ),
    )(x, wmod, bvec, noise_f)

    out = out.reshape(b, H, wp, cout)[:, :, :W, :]       # drop virtual-width columns
    return jnp.transpose(out, (0, 3, 1, 2))              # (b, cout, H, W)


# --------------------------------------------------------------------------- #
# Pure-JAX reference (reproduces the PyTorch forward exactly)
# --------------------------------------------------------------------------- #
def conv2demod_reference(img, ws, weight, A_w, A_b, B, noise, *, eps=1e-8):
    styles = ws @ A_w.T + A_b                                  # (b, C_in)
    w = weight[None] * styles[:, None, :, None, None]          # (b, C_out, C_in, k, k)
    dcoefs = lax.rsqrt(jnp.sum(jnp.square(w), axis=(2, 3, 4)) + eps)
    w = w * dcoefs[:, :, None, None, None]

    def one(x, wb):  # grouped conv (groups=b) == per-batch conv with its own weights
        return lax.conv_general_dilated(
            x[None], wb, window_strides=(1, 1), padding='SAME',
            dimension_numbers=('NCHW', 'OIHW', 'NCHW'))[0]

    out = jax.vmap(one)(img, w)
    return out + B[None, :, None, None] * noise


if __name__ == "__main__":
    b, cin, cout, zdim, k, H, W = 2, 4, 8, 32, 3, 16, 16
    key = jax.random.PRNGKey(0)
    k_img, k_ws, k_w, k_A, k_b, k_B, k_n = jax.random.split(key, 7)

    img = jax.random.normal(k_img, (b, cin, H, W), jnp.float32)
    ws = jax.random.normal(k_ws, (b, zdim), jnp.float32)

    # weight ~ xavier_normal_: std = sqrt(2 / (fan_in + fan_out))
    fan_in, fan_out = cin * k * k, cout * k * k
    weight = jax.random.normal(k_w, (cout, cin, k, k), jnp.float32) * jnp.sqrt(
        2.0 / (fan_in + fan_out))
    # A = nn.Linear(z_dim, in_channels): weight (C_in, z_dim), bias (C_in,)
    A_w = jax.random.normal(k_A, (cin, zdim), jnp.float32) / jnp.sqrt(zdim)
    A_b = jax.random.normal(k_b, (cin,), jnp.float32) * 0.01
    # Module inits B to zeros; use small random values so the noise path is exercised.
    B = jax.random.normal(k_B, (cout,), jnp.float32) * 0.1
    # torch.randn noise generated in forward -> deterministic JAX noise here.
    noise = jax.random.normal(k_n, (b, 1, H, W), jnp.float32)

    ref = conv2demod_reference(img, ws, weight, A_w, A_b, B, noise)

    # f32 MXU path (debug / tight tolerance).
    out_f32 = conv2demod(img, ws, weight, A_w, A_b, B, noise, mxu_dtype=jnp.float32)
    out_f32 = jax.block_until_ready(out_f32)
    assert out_f32.shape == (b, cout, H, W)
    assert jnp.allclose(out_f32, ref, atol=2e-4, rtol=2e-4), float(
        jnp.max(jnp.abs(out_f32 - ref)))

    # bf16 MXU operands (default fast path on all generations), f32 accumulation.
    out_bf16 = conv2demod(img, ws, weight, A_w, A_b, B, noise, mxu_dtype=jnp.bfloat16)
    out_bf16 = jax.block_until_ready(out_bf16)
    assert out_bf16.shape == (b, cout, H, W)
    assert jnp.allclose(out_bf16, ref, atol=1e-1, rtol=1e-1), float(
        jnp.max(jnp.abs(out_bf16 - ref)))

    print("KERNEL_OK")
</pallas_src>

<mosaic_0001>
module attributes {stable_mosaic.version = 11 : i64} {
  func.func @_conv2demod_kernel(%arg0: i32, %arg1: i32, %arg2: memref<1x328x4xf32, #tpu.memory_space<vmem>>, %arg3: memref<1x36x8xf32, #tpu.memory_space<vmem>>, %arg4: memref<1x8xf32, #tpu.memory_space<vmem>>, %arg5: memref<1x144x1xf32, #tpu.memory_space<vmem>>, %arg6: memref<1x144x8xf32, #tpu.memory_space<vmem>>, %arg7: memref<144x36xf32, #tpu.memory_space<vmem>>) attributes {dimension_semantics = [#tpu.dimension_semantics<parallel>, #tpu.dimension_semantics<parallel>], iteration_bounds = array<i64: 2, 2>, scalar_prefetch = 0 : i64, scratch_operands = 1 : i64, tpu.core_type = #tpu.core_type<tc>, window_params = [{transform_indices = @transform_0, window_bounds = array<i64: 1, 328, 4>}, {transform_indices = @transform_1, window_bounds = array<i64: 1, 36, 8>}, {pipeline_mode = #tpu.pipeline_mode<synchronous>, transform_indices = @transform_2, window_bounds = array<i64: 1, 8>}, {transform_indices = @transform_3, window_bounds = array<i64: 1, 144, 1>}, {transform_indices = @transform_4, window_bounds = array<i64: 1, 144, 8>}]} {
    %c144_i32 = arith.constant 144 : i32
    %0 = arith.muli %arg1, %c144_i32 : i32
    %c0_i32 = arith.constant 0 : i32
    %1 = arith.addi %0, %c0_i32 : i32
    %c0_i32_0 = arith.constant 0 : i32
    %2 = arith.addi %1, %c0_i32_0 : i32
    %c0 = arith.constant 0 : index
    %3 = arith.index_cast %2 : i32 to index
    %c0_1 = arith.constant 0 : index
    %4 = vector.load %arg2[%c0, %3, %c0_1] : memref<1x328x4xf32, #tpu.memory_space<vmem>>, vector<1x144x4xf32>
    %5 = vector.shape_cast %4 : vector<1x144x4xf32> to vector<144x4xf32>
    %c0_2 = arith.constant 0 : index
    %c0_3 = arith.constant 0 : index
    %6 = vector.load %arg7[%c0_2, %c0_3] : memref<144x36xf32, #tpu.memory_space<vmem>>, vector<144x4xf32>
    tpu.vector_store %arg7[%c0_2, %c0_3], %5 {strides = array<i32>} : memref<144x36xf32, #tpu.memory_space<vmem>>, vector<144x4xf32>,
    %c0_i32_4 = arith.constant 0 : i32
    %7 = arith.addi %0, %c0_i32_4 : i32
    %c1_i32 = arith.constant 1 : i32
    %8 = arith.addi %7, %c1_i32 : i32
    %c0_5 = arith.constant 0 : index
    %9 = arith.index_cast %8 : i32 to index
    %c0_6 = arith.constant 0 : index
    %10 = vector.load %arg2[%c0_5, %9, %c0_6] : memref<1x328x4xf32, #tpu.memory_space<vmem>>, vector<1x144x4xf32>
    %11 = vector.shape_cast %10 : vector<1x144x4xf32> to vector<144x4xf32>
    %c0_7 = arith.constant 0 : index
    %c4 = arith.constant 4 : index
    %12 = vector.load %arg7[%c0_7, %c4] : memref<144x36xf32, #tpu.memory_space<vmem>>, vector<144x4xf32>
    tpu.vector_store %arg7[%c0_7, %c4], %11 {strides = array<i32>} : memref<144x36xf32, #tpu.memory_space<vmem>>, vector<144x4xf32>,
    %c0_i32_8 = arith.constant 0 : i32
    %13 = arith.addi %0, %c0_i32_8 : i32
    %c2_i32 = arith.constant 2 : i32
    %14 = arith.addi %13, %c2_i32 : i32
    %c0_9 = arith.constant 0 : index
    %15 = arith.index_cast %14 : i32 to index
    %c0_10 = arith.constant 0 : index
    %16 = vector.load %arg2[%c0_9, %15, %c0_10] : memref<1x328x4xf32, #tpu.memory_space<vmem>>, vector<1x144x4xf32>
    %17 = vector.shape_cast %16 : vector<1x144x4xf32> to vector<144x4xf32>
    %c0_11 = arith.constant 0 : index
    %c8 = arith.constant 8 : index
    %18 = vector.load %arg7[%c0_11, %c8] : memref<144x36xf32, #tpu.memory_space<vmem>>, vector<144x4xf32>
    tpu.vector_store %arg7[%c0_11, %c8], %17 {strides = array<i32>} : memref<144x36xf32, #tpu.memory_space<vmem>>, vector<144x4xf32>,
    %c18_i32 = arith.constant 18 : i32
    %19 = arith.addi %0, %c18_i32 : i32
    %c0_i32_12 = arith.constant 0 : i32
    %20 = arith.addi %19, %c0_i32_12 : i32
    %c0_13 = arith.constant 0 : index
    %21 = arith.index_cast %20 : i32 to index
    %c0_14 = arith.constant 0 : index
    %22 = vector.load %arg2[%c0_13, %21, %c0_14] : memref<1x328x4xf32, #tpu.memory_space<vmem>>, vector<1x144x4xf32>
    %23 = vector.shape_cast %22 : vector<1x144x4xf32> to vector<144x4xf32>
    %c0_15 = arith.constant 0 : index
    %c12 = arith.constant 12 : index
    %24 = vector.load %arg7[%c0_15, %c12] : memref<144x36xf32, #tpu.memory_space<vmem>>, vector<144x4xf32>
    tpu.vector_store %arg7[%c0_15, %c12], %23 {strides = array<i32>} : memref<144x36xf32, #tpu.memory_space<vmem>>, vector<144x4xf32>,
    %c18_i32_16 = arith.constant 18 : i32
    %25 = arith.addi %0, %c18_i32_16 : i32
    %c1_i32_17 = arith.constant 1 : i32
    %26 = arith.addi %25, %c1_i32_17 : i32
    %c0_18 = arith.constant 0 : index
    %27 = arith.index_cast %26 : i32 to index
    %c0_19 = arith.constant 0 : index
    %28 = vector.load %arg2[%c0_18, %27, %c0_19] : memref<1x328x4xf32, #tpu.memory_space<vmem>>, vector<1x144x4xf32>
    %29 = vector.shape_cast %28 : vector<1x144x4xf32> to vector<144x4xf32>
    %c0_20 = arith.constant 0 : index
    %c16 = arith.constant 16 : index
    %30 = vector.load %arg7[%c0_20, %c16] : memref<144x36xf32, #tpu.memory_space<vmem>>, vector<144x4xf32>
    tpu.vector_store %arg7[%c0_20, %c16], %29 {strides = array<i32>} : memref<144x36xf32, #tpu.memory_space<vmem>>, vector<144x4xf32>,
    %c18_i32_21 = arith.constant 18 : i32
    %31 = arith.addi %0, %c18_i32_21 : i32
    %c2_i32_22 = arith.constant 2 : i32
    %32 = arith.addi %31, %c2_i32_22 : i32
    %c0_23 = arith.constant 0 : index
    %33 = arith.index_cast %32 : i32 to index
    %c0_24 = arith.constant 0 : index
    %34 = vector.load %arg2[%c0_23, %33, %c0_24] : memref<1x328x4xf32, #tpu.memory_space<vmem>>, vector<1x144x4xf32>
    %35 = vector.shape_cast %34 : vector<1x144x4xf32> to vector<144x4xf32>
    %c0_25 = arith.constant 0 : index
    %c20 = arith.constant 20 : index
    %36 = vector.load %arg7[%c0_25, %c20] : memref<144x36xf32, #tpu.memory_space<vmem>>, vector<144x4xf32>
    tpu.vector_store %arg7[%c0_25, %c20], %35 {strides = array<i32>} : memref<144x36xf32, #tpu.memory_space<vmem>>, vector<144x4xf32>,
    %c36_i32 = arith.constant 36 : i32
    %37 = arith.addi %0, %c36_i32 : i32
    %c0_i32_26 = arith.constant 0 : i32
    %38 = arith.addi %37, %c0_i32_26 : i32
    %c0_27 = arith.constant 0 : index
    %39 = arith.index_cast %38 : i32 to index
    %c0_28 = arith.constant 0 : index
    %40 = vector.load %arg2[%c0_27, %39, %c0_28] : memref<1x328x4xf32, #tpu.memory_space<vmem>>, vector<1x144x4xf32>
    %41 = vector.shape_cast %40 : vector<1x144x4xf32> to vector<144x4xf32>
    %c0_29 = arith.constant 0 : index
    %c24 = arith.constant 24 : index
    %42 = vector.load %arg7[%c0_29, %c24] : memref<144x36xf32, #tpu.memory_space<vmem>>, vector<144x4xf32>
    tpu.vector_store %arg7[%c0_29, %c24], %41 {strides = array<i32>} : memref<144x36xf32, #tpu.memory_space<vmem>>, vector<144x4xf32>,
    %c36_i32_30 = arith.constant 36 : i32
    %43 = arith.addi %0, %c36_i32_30 : i32
    %c1_i32_31 = arith.constant 1 : i32
    %44 = arith.addi %43, %c1_i32_31 : i32
    %c0_32 = arith.constant 0 : index
    %45 = arith.index_cast %44 : i32 to index
    %c0_33 = arith.constant 0 : index
    %46 = vector.load %arg2[%c0_32, %45, %c0_33] : memref<1x328x4xf32, #tpu.memory_space<vmem>>, vector<1x144x4xf32>
    %47 = vector.shape_cast %46 : vector<1x144x4xf32> to vector<144x4xf32>
    %c0_34 = arith.constant 0 : index
    %c28 = arith.constant 28 : index
    %48 = vector.load %arg7[%c0_34, %c28] : memref<144x36xf32, #tpu.memory_space<vmem>>, vector<144x4xf32>
    tpu.vector_store %arg7[%c0_34, %c28], %47 {strides = array<i32>} : memref<144x36xf32, #tpu.memory_space<vmem>>, vector<144x4xf32>,
    %c36_i32_35 = arith.constant 36 : i32
    %49 = arith.addi %0, %c36_i32_35 : i32
    %c2_i32_36 = arith.constant 2 : i32
    %50 = arith.addi %49, %c2_i32_36 : i32
    %c0_37 = arith.constant 0 : index
    %51 = arith.index_cast %50 : i32 to index
    %c0_38 = arith.constant 0 : index
    %52 = vector.load %arg2[%c0_37, %51, %c0_38] : memref<1x328x4xf32, #tpu.memory_space<vmem>>, vector<1x144x4xf32>
    %53 = vector.shape_cast %52 : vector<1x144x4xf32> to vector<144x4xf32>
    %c0_39 = arith.constant 0 : index
    %c32 = arith.constant 32 : index
    %54 = vector.load %arg7[%c0_39, %c32] : memref<144x36xf32, #tpu.memory_space<vmem>>, vector<144x4xf32>
    tpu.vector_store %arg7[%c0_39, %c32], %53 {strides = array<i32>} : memref<144x36xf32, #tpu.memory_space<vmem>>, vector<144x4xf32>,
    %c0_40 = arith.constant 0 : index
    %c0_41 = arith.constant 0 : index
    %55 = vector.load %arg7[%c0_40, %c0_41] : memref<144x36xf32, #tpu.memory_space<vmem>>, vector<144x36xf32>
    %c0_42 = arith.constant 0 : index
    %c0_43 = arith.constant 0 : index
    %c0_44 = arith.constant 0 : index
    %56 = vector.load %arg3[%c0_42, %c0_43, %c0_44] : memref<1x36x8xf32, #tpu.memory_space<vmem>>, vector<1x36x8xf32>
    %57 = vector.shape_cast %56 : vector<1x36x8xf32> to vector<36x8xf32>
    %cst = arith.constant dense<0.000000e+00> : vector<144x8xf32>
    %58 = tpu.matmul %55, %57, %cst {dimension_numbers = #tpu.dot_dimension_numbers<[1], [0], [0], [1], [0, 0, 1, 1], [], []>} : vector<144x36xf32>, vector<36x8xf32>, vector<144x8xf32> -> vector<144x8xf32>
    %c0_45 = arith.constant 0 : index
    %c0_46 = arith.constant 0 : index
    %c0_47 = arith.constant 0 : index
    %59 = vector.load %arg5[%c0_45, %c0_46, %c0_47] : memref<1x144x1xf32, #tpu.memory_space<vmem>>, vector<1x144x1xf32>
    %60 = vector.shape_cast %59 : vector<1x144x1xf32> to vector<144x1xf32>
    %c0_48 = arith.constant 0 : index
    %c0_49 = arith.constant 0 : index
    %61 = vector.load %arg4[%c0_48, %c0_49] : memref<1x8xf32, #tpu.memory_space<vmem>>, vector<1x8xf32>
    %62 = vector.broadcast %60 : vector<144x1xf32> to vector<144x8xf32>
    %63 = vector.broadcast %61 : vector<1x8xf32> to vector<144x8xf32>
    %64 = arith.mulf %62, %63 : vector<144x8xf32>
    %65 = arith.addf %58, %64 : vector<144x8xf32>
    %c0_50 = arith.constant 0 : index
    %c0_51 = arith.constant 0 : index
    %c0_52 = arith.constant 0 : index
    %66 = vector.load %arg6[%c0_50, %c0_51, %c0_52] : memref<1x144x8xf32, #tpu.memory_space<vmem>>, vector<1x144x8xf32>
    %67 = vector.shape_cast %66 : vector<1x144x8xf32> to vector<144x8xf32>
    %68 = vector.shape_cast %65 : vector<144x8xf32> to vector<1x144x8xf32>
    tpu.vector_store %arg6[%c0_50, %c0_51, %c0_52], %68 {strides = array<i32>} : memref<1x144x8xf32, #tpu.memory_space<vmem>>, vector<1x144x8xf32>,
    return
  }
  func.func @transform_0(%arg0: i32, %arg1: i32) -> (i32, i32, i32) {
    %c0_i32 = arith.constant 0 : i32
    %c0_i32_0 = arith.constant 0 : i32
    %c0_i32_1 = arith.constant 0 : i32
    return %arg0, %c0_i32, %c0_i32_0 : i32, i32, i32
  }
  func.func @transform_1(%arg0: i32, %arg1: i32) -> (i32, i32, i32) {
    %c0_i32 = arith.constant 0 : i32
    %c0_i32_0 = arith.constant 0 : i32
    %c0_i32_1 = arith.constant 0 : i32
    return %arg0, %c0_i32, %c0_i32_0 : i32, i32, i32
  }
  func.func @transform_2(%arg0: i32, %arg1: i32) -> (i32, i32) {
    %c0_i32 = arith.constant 0 : i32
    %c0_i32_0 = arith.constant 0 : i32
    %c0_i32_1 = arith.constant 0 : i32
    return %c0_i32, %c0_i32_0 : i32, i32
  }
  func.func @transform_3(%arg0: i32, %arg1: i32) -> (i32, i32, i32) {
    %c0_i32 = arith.constant 0 : i32
    %c0_i32_0 = arith.constant 0 : i32
    return %arg0, %arg1, %c0_i32 : i32, i32, i32
  }
  func.func @transform_4(%arg0: i32, %arg1: i32) -> (i32, i32, i32) {
    %c0_i32 = arith.constant 0 : i32
    %c0_i32_0 = arith.constant 0 : i32
    return %arg0, %arg1, %c0_i32 : i32, i32, i32
  }
}

</mosaic_0001>

<bundles_post_ra>
// kernel: tpu_custom_call.1
= control target key start
LH: loop header
LB: loop body
LE: loop exit
PB: predicated region body
PF: predicated region fallthrough
CT: control target
= control target key end

     0   :  { %s2110_s15 = smov 0   ;;  %s2112_s16 = smov 0   ;;  %s2822_s0 = inlined_call_operand.vmem [shape: f32[2,328,4], index: 0, kind: input, shape index: {}]   ;;  %s2823_s1 = inlined_call_operand.vmem [shape: f32[2,36,8], index: 1, kind: input, shape index: {}]   ;;  %s2824_s2 = inlined_call_operand.vmem [shape: f32[1,8], index: 2, kind: input, shape index: {}]   ;;  %s2825_s3 = inlined_call_operand.vmem [shape: f32[2,288,1], index: 3, kind: input, shape index: {}]   ;;  %s2826_s4 = inlined_call_operand.vmem [shape: f32[2,288,8], index: 4, kind: output, shape index: {}]  }
   0x1   :  { %s2114_s17 = smov 0   ;;  %s2116_s18 = smov 0  }
   0x2   :  { %s2118_s19 = smov 0  }
   0x3 LB: > { %s23_s20 = sadd.s32 1, %s2066_s17  ;;  %s26_s21 = sadd.s32 1, %s2070_s18  ;;  %s2074_s19 = sphi %s2118_s19, %s14_s19   ;;  %s2070_s18 = sphi %s2116_s18, %s2830_s18   ;;  %s2066_s17 = sphi %s2114_s17, %s2829_s17   ;;  %s2062_s16 = sphi %s2112_s16, %s2828_s16   ;;  %s2058_s15 = sphi %s2110_s15, %s2827_s15  }
   0x4   : > { %p24_p0 = scmp.ge.s32.totalorder %s23_s20, 2  ;;  %p1737_p1 = scmp.ge.s32.totalorder %s2074_s19, 1 }
   0x5   : > { %p203_p2 = scmp.lt.s32.totalorder %s2074_s19, 5 }
   0x6   : > { %s2832_s20 = smov (%p24_p0, %s23_s20), 0  ;;  %s2834_s21 = smov (!%p24_p0, %s26_s21), %s2070_s18 }
   0x7   : > { %p204_p3 = pnand %p1737_p1, %p203_p2  ;;  %p28_p4 = scmp.ge.s32.totalorder %s2834_s21, 2 }
   0x8   : > { %p247_p5 = scmp.lt.s32.totalorder (!%p204_p3), %s2062_s16, 1  ;;  %s277_s22 = smul.u32 (!%p204_p3), 144, %s2058_s15  ;;  %vm297_vm0 = vcmask (!%p204_p3), 31744   ;;  %vm1415_vm1 = vcmask (!%p204_p3), 1043456   ;;  %vm408_vm2 = vcmask (!%p204_p3), 64544   ;;  %vm519_vm3 = vcmask (!%p204_p3), 97344  }
   0x9   : > { %s2836_s21 = smov (%p28_p4, %s2834_s21), 0  ;;  %207 = sbr.rel (%p204_p3) target bundleno = 646 (0x286), region = 36 }
   0xa   : > { %s2076_s28 = smov (!%p204_p3), 4   ;;  %s2077_s29 = smov (!%p204_p3), 8   ;;  %vm630_vm4 = vcmask (!%p204_p3), 130144   ;;  %vm741_vm5 = vcmask (!%p204_p3), 162944   ;;  %vm852_vm6 = vcmask (!%p204_p3), 195744   ;;  %vm963_vm7 = vcmask (!%p204_p3), 228544  }
   0xb   : > { %s2078_s30 = smov (!%p204_p3), 12   ;;  %s2079_s5 = smov (!%p204_p3), 16   ;;  %vm1074_vm8 = vcmask (!%p204_p3), 261344   ;;  %vm1185_vm9 = vcmask (!%p204_p3), 294144   ;;  %vm1360_vm10 = vcmask (!%p204_p3), 293888   ;;  %vm1574_vm11 = vcmask (!%p204_p3), 64512  }
   0xc   : > { %s2080_s6 = smov (!%p204_p3), 20   ;;  %s2081_s7 = smov (!%p204_p3), 24  }
   0xd   : > { %s2082_s9 = smov (!%p204_p3), 28   ;;  %s2083_s13 = smov (!%p204_p3), 32  }
   0xe   : > { %s257_s14 = smul.u32 (!%p204_p3), 18, %s2058_s15 }
  0x10   : > { %s2838_s16 = smov (!%p247_p5, %s2062_s16), 1  ;;  %p260_p6 = scmp.lt.s32.totalorder %s257_s14, 35 }
  0x11   : > { %s1982_s23 = smul.u32 328, %s2838_s16 }
  0x12   : > { %s1983_s8 = smul.u32 40, %s2838_s16  ;;  %s2840_s14 = smov (!%p260_p6, %s257_s14), 35 }
  0x13   : > { %s251_s26 = scalar_lea.vmem %s2822_s0, %s1982_s23  ;;  %s1984_s15 = smul.u32 36, %s2838_s16 }
  0x14   : > { %s2149_s27 = scalar_lea.vmem %s251_s26, %s277_s22  ;;  %s256_s12 = scalar_lea.vmem %s2823_s1, %s1983_s8 }
  0x15   : > { %v1744_v0 = vld [vmem:[%s2149_s27 + $0x11] sm:$0xff]  ;;  %v1742_v1 = vld [vmem:[%s2149_s27 + $0x1] sm:$0xff]  ;;  %v1745_v2 = vld [vmem:[%s2149_s27 + $0x19] sm:$0xff]  ;;  %s2625_s16 = sadd.s32 %s1984_s15, %s2840_s14 }
  0x16   : > { %358 = vrot.lane.b32.xlu1 %v1744_v0, %s2076_s28  ;;  %354 = vrot.lane.b32.xlu0 %v1742_v1, %s2076_s28  ;;  %v1743_v3 = vld [vmem:[%s2149_s27 + $0x9] sm:$0xff]  ;;  %v1746_v5 = vld [vmem:[%s2149_s27 + $0x21] sm:$0xff]  ;;  %s1740_s22 = sshll.u32 %s2625_s16, 3 }
  0x17   : > { %v1747_v4 = vld [vmem:[%s2149_s27 + $0x29] sm:$0xff]  ;;  %v1749_v6 = vld [vmem:[%s2149_s27 + $0x39] sm:$0xff]  ;;  %v1748_v7 = vld [vmem:[%s2149_s27 + $0x31] sm:$0xff]  ;;  %s2641_s25 = scalar_lea.vmem %s2825_s3, %s1740_s22 }
  0x18   : > { %v1751_v8 = vld [vmem:[%s2149_s27 + $0x49] sm:$0xff]  ;;  %v1750_v9 = vld [vmem:[%s2149_s27 + $0x41] sm:$0xff]  ;;  %v1753_v10 = vld [vmem:[%s2149_s27 + $0x59] sm:$0xff] }
  0x19   : > { %v1752_v11 = vld [vmem:[%s2149_s27 + $0x51] sm:$0xff]  ;;  %v279_v13 = vld [vmem:[%s2149_s27] sm:$0xff]  ;;  %v280_v15 = vld [vmem:[%s2149_s27 + $0x8] sm:$0xff] }
  0x1a   : > { %360 = vrot.lane.b32.xlu1 %v1745_v2, %s2076_s28  ;;  %356 = vrot.lane.b32.xlu0 %v1743_v3, %s2076_s28  ;;  %v281_v12 = vld [vmem:[%s2149_s27 + $0x10] sm:$0xff]  ;;  %298 = vst.msk [vmem:[#allocation2] sm:$0xff] %vm297_vm0, %v279_v13  ;;  %v282_v14 = vld [vmem:[%s2149_s27 + $0x18] sm:$0xff]  ;;  %299 = vst.msk [vmem:[#allocation2 + $0x8] sm:$0xff] %vm297_vm0, %v280_v15 }
  0x1b   : > { %300 = vst.msk [vmem:[#allocation2 + $0x10] sm:$0xff] %vm297_vm0, %v281_v12  ;;  %301 = vst.msk [vmem:[#allocation2 + $0x18] sm:$0xff] %vm297_vm0, %v282_v14  ;;  %v284_v16 = vld [vmem:[%s2149_s27 + $0x28] sm:$0xff]  ;;  %v283_v18 = vld [vmem:[%s2149_s27 + $0x20] sm:$0xff] }
  0x1c   : > { %v1755_v17 = vld [vmem:[%s2149_s27 + $0x69] sm:$0xff]  ;;  %303 = vst.msk [vmem:[#allocation2 + $0x28] sm:$0xff] %vm297_vm0, %v284_v16  ;;  %v1754_v19 = vld [vmem:[%s2149_s27 + $0x61] sm:$0xff]  ;;  %302 = vst.msk [vmem:[#allocation2 + $0x20] sm:$0xff] %vm297_vm0, %v283_v18 }
  0x1d   : > { %v286_v20 = vld [vmem:[%s2149_s27 + $0x38] sm:$0xff]  ;;  %v285_v21 = vld [vmem:[%s2149_s27 + $0x30] sm:$0xff]  ;;  %v288_v22 = vld [vmem:[%s2149_s27 + $0x48] sm:$0xff] }
  0x1e   : > { %364 = vrot.lane.b32.xlu1 %v1747_v4, %s2076_s28  ;;  %362 = vrot.lane.b32.xlu0 %v1746_v5, %s2076_s28  ;;  %305 = vst.msk [vmem:[#allocation2 + $0x38] sm:$0xff] %vm297_vm0, %v286_v20  ;;  %304 = vst.msk [vmem:[#allocation2 + $0x30] sm:$0xff] %vm297_vm0, %v285_v21  ;;  %v287_v23 = vld [vmem:[%s2149_s27 + $0x40] sm:$0xff]  ;;  %v290_v24 = vld [vmem:[%s2149_s27 + $0x58] sm:$0xff] }
  0x1f   : > { %307 = vst.msk [vmem:[#allocation2 + $0x48] sm:$0xff] %vm297_vm0, %v288_v22  ;;  %306 = vst.msk [vmem:[#allocation2 + $0x40] sm:$0xff] %vm297_vm0, %v287_v23  ;;  %v1757_v25 = vld [vmem:[%s2149_s27 + $0x79] sm:$0xff]  ;;  %v289_v26 = vld [vmem:[%s2149_s27 + $0x50] sm:$0xff] }
  0x20   : > { %309 = vst.msk [vmem:[#allocation2 + $0x58] sm:$0xff] %vm297_vm0, %v290_v24  ;;  %v1756_v27 = vld [vmem:[%s2149_s27 + $0x71] sm:$0xff]  ;;  %308 = vst.msk [vmem:[#allocation2 + $0x50] sm:$0xff] %vm297_vm0, %v289_v26  ;;  %v292_v28 = vld [vmem:[%s2149_s27 + $0x68] sm:$0xff] }
  0x21   : > { %v291_v29 = vld [vmem:[%s2149_s27 + $0x60] sm:$0xff]  ;;  %311 = vst.msk [vmem:[#allocation2 + $0x68] sm:$0xff] %vm297_vm0, %v292_v28  ;;  %v294_v30 = vld [vmem:[%s2149_s27 + $0x78] sm:$0xff]  ;;  %v293_v31 = vld [vmem:[%s2149_s27 + $0x70] sm:$0xff] }
  0x22   : > { %368 = vrot.lane.b32.xlu1 %v1749_v6, %s2076_s28  ;;  %366 = vrot.lane.b32.xlu0 %v1748_v7, %s2076_s28  ;;  %310 = vst.msk [vmem:[#allocation2 + $0x60] sm:$0xff] %vm297_vm0, %v291_v29  ;;  %313 = vst.msk [vmem:[#allocation2 + $0x78] sm:$0xff] %vm297_vm0, %v294_v30  ;;  %v296_v32 = vld [vmem:[%s2149_s27 + $0x88] sm:$0xff]  ;;  %v295_v33 = vld [vmem:[%s2149_s27 + $0x80] sm:$0xff] }
  0x23   : > { %312 = vst.msk [vmem:[#allocation2 + $0x70] sm:$0xff] %vm297_vm0, %v293_v31  ;;  %v1759_v34 = vld [vmem:[%s2149_s27 + $0x89] sm:$0xff]  ;;  %v1758_v35 = vld [vmem:[%s2149_s27 + $0x81] sm:$0xff]  ;;  %315 = vst.msk [vmem:[#allocation2 + $0x88] sm:$0xff] %vm297_vm0, %v296_v32 }
  0x24   : > { %314 = vst.msk [vmem:[#allocation2 + $0x80] sm:$0xff] %vm297_vm0, %v295_v33  ;;  %v1761_v36 = vld [vmem:[%s2149_s27 + $0xa] sm:$0xff]  ;;  %v1760_v37 = vld [vmem:[%s2149_s27 + $0x2] sm:$0xff]  ;;  %v1763_v38 = vld [vmem:[%s2149_s27 + $0x1a] sm:$0xff] }
  0x25   : > { %v1762_v39 = vld [vmem:[%s2149_s27 + $0x12] sm:$0xff]  ;;  %v1765_v40 = vld [vmem:[%s2149_s27 + $0x2a] sm:$0xff]  ;;  %v1764_v41 = vld [vmem:[%s2149_s27 + $0x22] sm:$0xff] }
  0x26   : > { %372 = vrot.lane.b32.xlu1 %v1751_v8, %s2076_s28  ;;  %370 = vrot.lane.b32.xlu0 %v1750_v9, %s2076_s28  ;;  %v2236_v42 = vld [vmem:[%s2149_s27 + $0x3a] sm:$0xff]  ;;  %v2239_v43 = vld [vmem:[%s2149_s27 + $0x32] sm:$0xff] }
  0x27   : > { %v2246_v44 = vld [vmem:[%s2149_s27 + $0x4a] sm:$0xff]  ;;  %v2249_v45 = vld [vmem:[%s2149_s27 + $0x42] sm:$0xff]  ;;  %v2256_v46 = vld [vmem:[%s2149_s27 + $0x52] sm:$0xff] }
  0x28   : > { %v1796_v47 = vld [vmem:[%s2149_s27 + $0x13] sm:$0xff]  ;;  %v1797_v49 = vld [vmem:[%s2149_s27 + $0x1b] sm:$0xff]  ;;  %v1832_v50 = vld [vmem:[%s2149_s27 + $0x24] sm:$0xff] }
  0x29   : > { %v1814_v48 = vld [vmem:[%s2149_s27 + $0x14] sm:$0xff]  ;;  %v1815_v51 = vld [vmem:[%s2149_s27 + $0x1c] sm:$0xff]  ;;  %v1833_v53 = vld [vmem:[%s2149_s27 + $0x2c] sm:$0xff] }
  0x2a   : > { %376 = vrot.lane.b32.xlu1 %v1753_v10, %s2076_s28  ;;  %374 = vrot.lane.b32.xlu0 %v1752_v11, %s2076_s28  ;;  %v2273_v52 = vld [vmem:[%s2149_s27 + $0x5a] sm:$0xff]  ;;  %v1788_v54 = vld [vmem:[%s2149_s27 + $0x62] sm:$0xff] }
  0x2b   : > { %v1850_v55 = vld [vmem:[%s2149_s27 + $0x25] sm:$0xff]  ;;  %v1851_v61 = vld [vmem:[%s2149_s27 + $0x2d] sm:$0xff]  ;;  %v1225_v0 = vld [vmem:[%s256_s12 + $0x18] sm:$0xff] }
  0x2c   : > { %v1798_v56 = vld [vmem:[%s2149_s27 + $0x23] sm:$0xff]  ;;  %v1224_v63 = vld [vmem:[%s256_s12 + $0x10] sm:$0xff]  ;;  %v2357_v22 = vld [vmem:[%s2149_s27 + $0x7a] sm:$0xff] }
  0x2d   : > { %v1789_v57 = vld [vmem:[%s2149_s27 + $0x6a] sm:$0xff]  ;;  %v1222_v58 = vld [vmem:[%s256_s12] sm:$0xff]  ;;  %v1972_v1 = vpack.c.bf16 %v1225_v0, %v1224_v63  ;;  %v2314_v8 = vld [vmem:[%s2149_s27 + $0x34] sm:$0xff] }
  0x2e   : > { %380 = vrot.lane.b32.xlu1 %v1755_v17, %s2076_s28  ;;  %378 = vrot.lane.b32.xlu0 %v1754_v19, %s2076_s28  ;;  %v1223_v59 = vld [vmem:[%s256_s12 + $0x8] sm:$0xff]  ;;  %v1226_v4 = vld [vmem:[%s256_s12 + $0x20] sm:$0xf] }
  0x2f   : > { %v1968_v60 = vpack.c.bf16 %v1223_v59, %v1222_v58  ;;  %v1806_v62 = vld [vmem:[%s2149_s27 + $0x63] sm:$0xff]  ;;  %v1799_v2 = vld [vmem:[%s2149_s27 + $0x2b] sm:$0xff]  ;;  %v2324_v10 = vld [vmem:[%s2149_s27 + $0x74] sm:$0xff] }
  0x30   : > { %v1868_v3 = vld [vmem:[%s2149_s27 + $0x26] sm:$0xff]  ;;  %v1869_v6 = vld [vmem:[%s2149_s27 + $0x2e] sm:$0xff]  ;;  %v2339_v14 = vld [vmem:[%s2149_s27 + $0x7c] sm:$0xff] }
  0x31   : > { %1969 = vmatprep.subr.bf16.mxu0 %v1968_v60  ;;  %1976 = vmatprep.subr.bf16.mxu1 %v1968_v60  ;;  %v1807_v5 = vld [vmem:[%s2149_s27 + $0x6b] sm:$0xff]  ;;  %v2342_v15 = vld [vmem:[%s2149_s27 + $0x3c] sm:$0xff]  ;;  %v1800_v26 = vld [vmem:[%s2149_s27 + $0x33] sm:$0xff] }
  0x32   : > { %384 = vrot.lane.b32.xlu1 %v1757_v25, %s2076_s28  ;;  %382 = vrot.lane.b32.xlu0 %v1756_v27, %s2076_s28  ;;  %v2306_v7 = vld [vmem:[%s2149_s27 + $0x64] sm:$0xff]  ;;  %v2317_v9 = vld [vmem:[%s2149_s27 + $0x6c] sm:$0xff] }
  0x33   : > { %1971 = vmatpush3.bf16.msra.mxu0 %v1968_v60  ;;  %1979 = vmatpush3.bf16.msra.mxu1 %v1968_v60  ;;  %v2330_v11 = vld [vmem:[%s2149_s27 + $0x72] sm:$0xff]  ;;  %v1861_v29 = vld [vmem:[%s2149_s27 + $0x7d] sm:$0xff] }
  0x34   : > { %1973 = vmatprep.subr.bf16.mxu0 %v1972_v1  ;;  %1977 = vmatprep.subr.bf16.mxu1 %v1972_v1  ;;  %v1860_v18 = vld [vmem:[%s2149_s27 + $0x75] sm:$0xff]  ;;  %v1853_v30 = vld [vmem:[%s2149_s27 + $0x3d] sm:$0xff]  ;;  %v2438_v63 = vld [vmem:[%s2149_s27 + $0x4c] sm:$0xff] }
  0x35   : > { %v1852_v19 = vld [vmem:[%s2149_s27 + $0x35] sm:$0xff]  ;;  %v2426_v59 = vld [vmem:[%s2149_s27 + $0x82] sm:$0xff] }
  0x36   : > { %388 = vrot.lane.b32.xlu1 %v1759_v34, %s2076_s28  ;;  %386 = vrot.lane.b32.xlu0 %v1758_v35, %s2076_s28  ;;  %v1808_v25 = vld [vmem:[%s2149_s27 + $0x73] sm:$0xff] }
  0x37   : > { %1975 = vmatpush3.bf16.msra.mxu0 %v1972_v1  ;;  %1980 = vmatpush3.bf16.msra.mxu1 %v1972_v1  ;;  %v1878_v33 = vld [vmem:[%s2149_s27 + $0x76] sm:$0xff] }
  0x38   : > { %1939 = vmatprep.subr.msk.mxu0 %vm1415_vm1, %v1226_v4  ;;  %1978 = vmatprep.subr.msk.mxu1 %vm1415_vm1, %v1226_v4  ;;  %v1870_v34 = vld [vmem:[%s2149_s27 + $0x36] sm:$0xff] }
  0x3a   : > { %467 = vrot.lane.b32.xlu1 %v1761_v36, %s2077_s29  ;;  %465 = vrot.lane.b32.xlu0 %v1760_v37, %s2077_s29  ;;  %v1809_v37 = vld [vmem:[%s2149_s27 + $0x7b] sm:$0xff] }
  0x3b   : > { %1940 = vmatpush3.msk.msra.mxu0 %vm1415_vm1, %v1226_v4  ;;  %1981 = vmatpush3.msk.msra.mxu1 %vm1415_vm1, %v1226_v4 }
  0x3e   : > { %471 = vrot.lane.b32.xlu1 %v1763_v38, %s2077_s29  ;;  %469 = vrot.lane.b32.xlu0 %v1762_v39, %s2077_s29 }
  0x42   : > { %475 = vrot.lane.b32.xlu1 %v1765_v40, %s2077_s29  ;;  %473 = vrot.lane.b32.xlu0 %v1764_v41, %s2077_s29 }
  0x46   : > { %479 = vrot.lane.b32.xlu1 %v2236_v42, %s2077_s29  ;;  %477 = vrot.lane.b32.xlu0 %v2239_v43, %s2077_s29 }
  0x4a   : > { %483 = vrot.lane.b32.xlu1 %v2246_v44, %s2077_s29  ;;  %481 = vrot.lane.b32.xlu0 %v2249_v45, %s2077_s29 }
  0x4e   : > { %576 = vrot.lane.b32.xlu1 %v1762_v39, %s2078_s30  ;;  %485 = vrot.lane.b32.xlu0 %v2256_v46, %s2077_s29 }
  0x52   : > { %687 = vrot.lane.b32.xlu1 %v1796_v47, %s2079_s5  ;;  %578 = vrot.lane.b32.xlu0 %v1763_v38, %s2078_s30  ;;  %v1801_v38 = vld [vmem:[%s2149_s27 + $0x3b] sm:$0xff] }
  0x53   : > { %v1871_v47 = vld [vmem:[%s2149_s27 + $0x3e] sm:$0xff] }
  0x56   : > { %798 = vrot.lane.b32.xlu1 %v1814_v48, %s2080_s6  ;;  %689 = vrot.lane.b32.xlu0 %v1797_v49, %s2079_s5 }
  0x5a   : > { %909 = vrot.lane.b32.xlu1 %v1832_v50, %s2081_s7  ;;  %800 = vrot.lane.b32.xlu0 %v1815_v51, %s2080_s6 }
  0x5e   : > { %580 = vrot.lane.b32.xlu1 %v1764_v41, %s2078_s30  ;;  %487 = vrot.lane.b32.xlu0 %v2273_v52, %s2077_s29 }
  0x62   : > { %911 = vrot.lane.b32.xlu1 %v1833_v53, %s2081_s7  ;;  %596 = vrot.lane.b32.xlu0 %v1788_v54, %s2078_s30 }
  0x66   : > { %582 = vrot.lane.b32.xlu1 %v1765_v40, %s2078_s30  ;;  %1020 = vrot.lane.b32.xlu0 %v1850_v55, %s2082_s9 }
  0x6a   : > { %691 = vrot.lane.b32.xlu1 %v1798_v56, %s2079_s5  ;;  %598 = vrot.lane.b32.xlu0 %v1789_v57, %s2078_s30  ;;  %v2417_v56 = vld [vmem:[%s2149_s27 + $0x84] sm:$0xff] }
  0x6e   : > { %1022 = vrot.lane.b32.xlu1 %v1851_v61, %s2082_s9  ;;  %707 = vrot.lane.b32.xlu0 %v1806_v62, %s2079_s5  ;;  %v2435_v62 = vld [vmem:[%s2149_s27 + $0x8c] sm:$0xff] }
  0x72   : > { %693 = vrot.lane.b32.xlu1 %v1799_v2, %s2079_s5  ;;  %1131 = vrot.lane.b32.xlu0 %v1868_v3, %s2083_s13  ;;  %v1854_v2 = vld [vmem:[%s2149_s27 + $0x45] sm:$0xff] }
  0x76   : > { %802 = vrot.lane.b32.xlu1 %v1832_v50, %s2080_s6  ;;  %709 = vrot.lane.b32.xlu0 %v1807_v5, %s2079_s5  ;;  %v2453_v5 = vld [vmem:[%s2149_s27 + $0x8a] sm:$0xff] }
  0x7a   : > { %1133 = vrot.lane.b32.xlu1 %v1869_v6, %s2083_s13  ;;  %818 = vrot.lane.b32.xlu0 %v2306_v7, %s2080_s6  ;;  %v2084_v6 = vmov 0  }
  0x7b   : > { %2035 = vset.pattern.permute.xlu1 %v2084_v6  ;;  %2034 = vset.pattern.permute.xlu0 %v2084_v6  ;;  %v1805_v6 = vld [vmem:[%s2149_s27 + $0x5b] sm:$0xff] }
  0x7e   : > { %804 = vrot.lane.b32.xlu1 %v1833_v53, %s2080_s6  ;;  %489 = vrot.lane.b32.xlu0 %v1788_v54, %s2077_s29  ;;  %v2408_v53 = vld [vmem:[%s2149_s27 + $0x44] sm:$0xff] }
  0x82   : > { %913 = vrot.lane.b32.xlu1 %v2314_v8, %s2081_s7  ;;  %820 = vrot.lane.b32.xlu0 %v2317_v9, %s2080_s6 }
  0x86   : > { %491 = vrot.lane.b32.xlu1 %v1789_v57, %s2077_s29  ;;  %929 = vrot.lane.b32.xlu0 %v2324_v10, %s2081_s7 }
  0x88   : > { %v359_v12 = vpop.permute.xlu1 %358  ;;  %v355_v13 = vpop.permute.xlu0 %354 }
  0x89   : > { %411 = vst.msk [vmem:[#allocation2 + $0x10] sm:$0xff] %vm408_vm2, %v359_v12  ;;  %409 = vst.msk [vmem:[#allocation2] sm:$0xff] %vm408_vm2, %v355_v13  ;;  %v1802_v12 = vld [vmem:[%s2149_s27 + $0x43] sm:$0xff] }
  0x8a   : > { %600 = vrot.lane.b32.xlu1 %v2330_v11, %s2078_s30  ;;  %584 = vrot.lane.b32.xlu0 %v2239_v43, %s2078_s30  ;;  %v1879_v43 = vld [vmem:[%s2149_s27 + $0x7e] sm:$0xff] }
  0x8c   : > { %v361_v16 = vpop.permute.xlu1 %360  ;;  %v357_v17 = vpop.permute.xlu0 %356 }
  0x8d   : > { %412 = vst.msk [vmem:[#allocation2 + $0x18] sm:$0xff] %vm408_vm2, %v361_v16  ;;  %410 = vst.msk [vmem:[#allocation2 + $0x8] sm:$0xff] %vm408_vm2, %v357_v17  ;;  %v1855_v16 = vld [vmem:[%s2149_s27 + $0x4d] sm:$0xff] }
  0x8e   : > { %931 = vrot.lane.b32.xlu1 %v2339_v14, %s2081_s7  ;;  %915 = vrot.lane.b32.xlu0 %v2342_v15, %s2081_s7 }
  0x90   : > { %v365_v20 = vpop.permute.xlu1 %364  ;;  %v363_v21 = vpop.permute.xlu0 %362 }
  0x91   : > { %414 = vst.msk [vmem:[#allocation2 + $0x28] sm:$0xff] %vm408_vm2, %v365_v20  ;;  %413 = vst.msk [vmem:[#allocation2 + $0x20] sm:$0xff] %vm408_vm2, %v363_v21 }
  0x92   : > { %1040 = vrot.lane.b32.xlu1 %v1860_v18, %s2082_s9  ;;  %1024 = vrot.lane.b32.xlu0 %v1852_v19, %s2082_s9  ;;  %v1880_v18 = vld [vmem:[%s2149_s27 + $0x86] sm:$0xff] }
  0x93   : > { %v1872_v19 = vld [vmem:[%s2149_s27 + $0x46] sm:$0xff] }
  0x94   : > { %v369_v23 = vpop.permute.xlu1 %368  ;;  %v367_v24 = vpop.permute.xlu0 %366 }
  0x95   : > { %416 = vst.msk [vmem:[#allocation2 + $0x38] sm:$0xff] %vm408_vm2, %v369_v23  ;;  %415 = vst.msk [vmem:[#allocation2 + $0x30] sm:$0xff] %vm408_vm2, %v367_v24  ;;  %v1803_v23 = vld [vmem:[%s2149_s27 + $0x4b] sm:$0xff] }
  0x96   : > { %602 = vrot.lane.b32.xlu1 %v2357_v22, %s2078_s30  ;;  %586 = vrot.lane.b32.xlu0 %v2236_v42, %s2078_s30 }
  0x98   : > { %v373_v27 = vpop.permute.xlu1 %372  ;;  %v371_v28 = vpop.permute.xlu0 %370 }
  0x99   : > { %418 = vst.msk [vmem:[#allocation2 + $0x48] sm:$0xff] %vm408_vm2, %v373_v27  ;;  %417 = vst.msk [vmem:[#allocation2 + $0x40] sm:$0xff] %vm408_vm2, %v371_v28  ;;  %v1881_v28 = vld [vmem:[%s2149_s27 + $0x8e] sm:$0xff] }
  0x9a   : > { %711 = vrot.lane.b32.xlu1 %v1808_v25, %s2079_s5  ;;  %695 = vrot.lane.b32.xlu0 %v1800_v26, %s2079_s5 }
  0x9c   : > { %v377_v31 = vpop.permute.xlu1 %376  ;;  %v375_v32 = vpop.permute.xlu0 %374 }
  0x9d   : > { %420 = vst.msk [vmem:[#allocation2 + $0x58] sm:$0xff] %vm408_vm2, %v377_v31  ;;  %419 = vst.msk [vmem:[#allocation2 + $0x50] sm:$0xff] %vm408_vm2, %v375_v32 }
  0x9e   : > { %1042 = vrot.lane.b32.xlu1 %v1861_v29, %s2082_s9  ;;  %1026 = vrot.lane.b32.xlu0 %v1853_v30, %s2082_s9  ;;  %v1873_v29 = vld [vmem:[%s2149_s27 + $0x4e] sm:$0xff] }
  0xa0   : > { %v381_v35 = vpop.permute.xlu1 %380  ;;  %v379_v36 = vpop.permute.xlu0 %378 }
  0xa1   : > { %422 = vst.msk [vmem:[#allocation2 + $0x68] sm:$0xff] %vm408_vm2, %v381_v35  ;;  %421 = vst.msk [vmem:[#allocation2 + $0x60] sm:$0xff] %vm408_vm2, %v379_v36 }
  0xa2   : > { %1151 = vrot.lane.b32.xlu1 %v1878_v33, %s2083_s13  ;;  %1135 = vrot.lane.b32.xlu0 %v1870_v34, %s2083_s13  ;;  %v2504_v34 = vld [vmem:[%s2149_s27 + $0x54] sm:$0xff] }
  0xa4   : > { %v385_v39 = vpop.permute.xlu1 %384  ;;  %v383_v40 = vpop.permute.xlu0 %382 }
  0xa5   : > { %424 = vst.msk [vmem:[#allocation2 + $0x78] sm:$0xff] %vm408_vm2, %v385_v39  ;;  %423 = vst.msk [vmem:[#allocation2 + $0x70] sm:$0xff] %vm408_vm2, %v383_v40 }
  0xa6   : > { %713 = vrot.lane.b32.xlu1 %v1809_v37, %s2079_s5  ;;  %697 = vrot.lane.b32.xlu0 %v1801_v38, %s2079_s5  ;;  %v2513_v37 = vld [vmem:[%s2149_s27 + $0x94] sm:$0xff] }
  0xa8   : > { %v389_v41 = vpop.permute.xlu1 %388  ;;  %v387_v42 = vpop.permute.xlu0 %386 }
  0xa9   : > { %426 = vst.msk [vmem:[#allocation2 + $0x88] sm:$0xff] %vm408_vm2, %v389_v41  ;;  %425 = vst.msk [vmem:[#allocation2 + $0x80] sm:$0xff] %vm408_vm2, %v387_v42  ;;  %v1794_v41 = vld [vmem:[%s2149_s27 + $0x92] sm:$0xff] }
  0xaa   : > { %822 = vrot.lane.b32.xlu1 %v2324_v10, %s2080_s6  ;;  %806 = vrot.lane.b32.xlu0 %v2314_v8, %s2080_s6 }
  0xac   : > { %v468_v48 = vpop.permute.xlu1 %467  ;;  %v466_v49 = vpop.permute.xlu0 %465 }
  0xad   : > { %521 = vst.msk [vmem:[#allocation2 + $0x8] sm:$0xff] %vm519_vm3, %v468_v48  ;;  %520 = vst.msk [vmem:[#allocation2] sm:$0xff] %vm519_vm3, %v466_v49  ;;  %v2532_v48 = vld [vmem:[%s2149_s27 + $0x5c] sm:$0xff] }
  0xae   : > { %1153 = vrot.lane.b32.xlu1 %v1879_v43, %s2083_s13  ;;  %1137 = vrot.lane.b32.xlu0 %v1871_v47, %s2083_s13  ;;  %v2529_v47 = vld [vmem:[%s2149_s27 + $0x9c] sm:$0xff] }
  0xb0   : > { %v472_v50 = vpop.permute.xlu1 %471  ;;  %v470_v51 = vpop.permute.xlu0 %469 }
  0xb1   : > { %523 = vst.msk [vmem:[#allocation2 + $0x18] sm:$0xff] %vm519_vm3, %v472_v50  ;;  %522 = vst.msk [vmem:[#allocation2 + $0x10] sm:$0xff] %vm519_vm3, %v470_v51 }
  0xb2   : > { %808 = vrot.lane.b32.xlu1 %v2342_v15, %s2080_s6  ;;  %493 = vrot.lane.b32.xlu0 %v2330_v11, %s2077_s29  ;;  %v1810_v11 = vld [vmem:[%s2149_s27 + $0x83] sm:$0xff]  ;;  %v1863_v15 = vld [vmem:[%s2149_s27 + $0x8d] sm:$0xff] }
  0xb4   : > { %v476_v54 = vpop.permute.xlu1 %475  ;;  %v474_v55 = vpop.permute.xlu0 %473 }
  0xb5   : > { %525 = vst.msk [vmem:[#allocation2 + $0x28] sm:$0xff] %vm519_vm3, %v476_v54  ;;  %524 = vst.msk [vmem:[#allocation2 + $0x20] sm:$0xff] %vm519_vm3, %v474_v55 }
  0xb6   : > { %917 = vrot.lane.b32.xlu1 %v2408_v53, %s2081_s7  ;;  %824 = vrot.lane.b32.xlu0 %v2339_v14, %s2080_s6 }
  0xb8   : > { %v480_v57 = vpop.permute.xlu1 %479  ;;  %v478_v58 = vpop.permute.xlu0 %477 }
  0xb9   : > { %527 = vst.msk [vmem:[#allocation2 + $0x38] sm:$0xff] %vm519_vm3, %v480_v57  ;;  %526 = vst.msk [vmem:[#allocation2 + $0x30] sm:$0xff] %vm519_vm3, %v478_v58 }
  0xba   : > { %495 = vrot.lane.b32.xlu1 %v2357_v22, %s2077_s29  ;;  %933 = vrot.lane.b32.xlu0 %v2417_v56, %s2081_s7  ;;  %v1811_v22 = vld [vmem:[%s2149_s27 + $0x8b] sm:$0xff] }
  0xbc   : > { %v484_v60 = vpop.permute.xlu1 %483  ;;  %v482_v61 = vpop.permute.xlu0 %481 }
  0xbd   : > { %529 = vst.msk [vmem:[#allocation2 + $0x48] sm:$0xff] %vm519_vm3, %v484_v60  ;;  %528 = vst.msk [vmem:[#allocation2 + $0x40] sm:$0xff] %vm519_vm3, %v482_v61  ;;  %v1804_v60 = vld [vmem:[%s2149_s27 + $0x53] sm:$0xff] }
  0xbe   : > { %604 = vrot.lane.b32.xlu1 %v2426_v59, %s2078_s30  ;;  %588 = vrot.lane.b32.xlu0 %v2249_v45, %s2078_s30  ;;  %v1862_v45 = vld [vmem:[%s2149_s27 + $0x85] sm:$0xff] }
  0xc0   : > { %v577_v0 = vpop.permute.xlu1 %576  ;;  %v486_v1 = vpop.permute.xlu0 %485 }
  0xc1   : > { %631 = vst.msk [vmem:[#allocation2] sm:$0xff] %vm630_vm4, %v577_v0  ;;  %v1857_v0 = vld [vmem:[%s2149_s27 + $0x5d] sm:$0xff] }
  0xc2   : > { %530 = vst.msk [vmem:[#allocation2 + $0x50] sm:$0xff] %vm519_vm3, %v486_v1  ;;  %935 = vrot.lane.b32.xlu1 %v2435_v62, %s2081_s7  ;;  %919 = vrot.lane.b32.xlu0 %v2438_v63, %s2081_s7 }
  0xc4   : > { %v688_v3 = vpop.permute.xlu1 %687  ;;  %v579_v4 = vpop.permute.xlu0 %578 }
  0xc5   : > { %742 = vst.msk [vmem:[#allocation2] sm:$0xff] %vm741_vm5, %v688_v3 }
  0xc6   : > { %632 = vst.msk [vmem:[#allocation2 + $0x8] sm:$0xff] %vm630_vm4, %v579_v4  ;;  %1044 = vrot.lane.b32.xlu1 %v1862_v45, %s2082_s9  ;;  %1028 = vrot.lane.b32.xlu0 %v1854_v2, %s2082_s9  ;;  %v1882_v45 = vld [vmem:[%s2149_s27 + $0x96] sm:$0xff] }
  0xc7   : > { %v1874_v2 = vld [vmem:[%s2149_s27 + $0x56] sm:$0xff] }
  0xc8   : > { %v799_v8 = vpop.permute.xlu1 %798  ;;  %v690_v10 = vpop.permute.xlu0 %689 }
  0xc9   : > { %853 = vst.msk [vmem:[#allocation2] sm:$0xff] %vm852_vm6, %v799_v8 }
  0xca   : > { %743 = vst.msk [vmem:[#allocation2 + $0x8] sm:$0xff] %vm741_vm5, %v690_v10  ;;  %606 = vrot.lane.b32.xlu1 %v2453_v5, %s2078_s30  ;;  %590 = vrot.lane.b32.xlu0 %v2246_v44, %s2078_s30 }
  0xcc   : > { %v910_v13 = vpop.permute.xlu1 %909  ;;  %v801_v14 = vpop.permute.xlu0 %800 }
  0xcd   : > { %964 = vst.msk [vmem:[#allocation2] sm:$0xff] %vm963_vm7, %v910_v13  ;;  %v1883_v13 = vld [vmem:[%s2149_s27 + $0x9e] sm:$0xff] }
  0xce   : > { %854 = vst.msk [vmem:[#allocation2 + $0x8] sm:$0xff] %vm852_vm6, %v801_v14  ;;  %715 = vrot.lane.b32.xlu1 %v1810_v11, %s2079_s5  ;;  %699 = vrot.lane.b32.xlu0 %v1802_v12, %s2079_s5  ;;  %v1875_v14 = vld [vmem:[%s2149_s27 + $0x5e] sm:$0xff] }
  0xd0   : > { %v581_v17 = vpop.permute.xlu1 %580  ;;  %v488_v44 = vpop.permute.xlu0 %487 }
  0xd1   : > { %633 = vst.msk [vmem:[#allocation2 + $0x10] sm:$0xff] %vm630_vm4, %v581_v17 }
  0xd2   : > { %531 = vst.msk [vmem:[#allocation2 + $0x58] sm:$0xff] %vm519_vm3, %v488_v44  ;;  %1046 = vrot.lane.b32.xlu1 %v1863_v15, %s2082_s9  ;;  %1030 = vrot.lane.b32.xlu0 %v1855_v16, %s2082_s9 }
  0xd4   : > { %v912_v20 = vpop.permute.xlu1 %911  ;;  %v597_v21 = vpop.permute.xlu0 %596 }
  0xd5   : > { %965 = vst.msk [vmem:[#allocation2 + $0x8] sm:$0xff] %vm963_vm7, %v912_v20 }
  0xd6   : > { %641 = vst.msk [vmem:[#allocation2 + $0x50] sm:$0xff] %vm630_vm4, %v597_v21  ;;  %1155 = vrot.lane.b32.xlu1 %v1880_v18, %s2083_s13  ;;  %1139 = vrot.lane.b32.xlu0 %v1872_v19, %s2083_s13  ;;  %v1848_v18 = vld [vmem:[%s2149_s27 + $0xa4] sm:$0xff] }
  0xd8   : > { %v583_v24 = vpop.permute.xlu1 %582  ;;  %v1021_v25 = vpop.permute.xlu0 %1020 }
  0xd9   : > { %634 = vst.msk [vmem:[#allocation2 + $0x18] sm:$0xff] %vm630_vm4, %v583_v24 }
  0xda   : > { %1075 = vst.msk [vmem:[#allocation2] sm:$0xff] %vm1074_vm8, %v1021_v25  ;;  %717 = vrot.lane.b32.xlu1 %v1811_v22, %s2079_s5  ;;  %701 = vrot.lane.b32.xlu0 %v1803_v23, %s2079_s5  ;;  %v1849_v23 = vld [vmem:[%s2149_s27 + $0xac] sm:$0xff] }
  0xdc   : > { %v692_v26 = vpop.permute.xlu1 %691  ;;  %v599_v27 = vpop.permute.xlu0 %598 }
  0xdd   : > { %744 = vst.msk [vmem:[#allocation2 + $0x10] sm:$0xff] %vm741_vm5, %v692_v26  ;;  %v1866_v26 = vld [vmem:[%s2149_s27 + $0xa5] sm:$0xff] }
  0xde   : > { %642 = vst.msk [vmem:[#allocation2 + $0x58] sm:$0xff] %vm630_vm4, %v599_v27  ;;  %826 = vrot.lane.b32.xlu1 %v2417_v56, %s2080_s6  ;;  %810 = vrot.lane.b32.xlu0 %v2408_v53, %s2080_s6  ;;  %v1856_v53 = vld [vmem:[%s2149_s27 + $0x55] sm:$0xff]  ;;  %v1858_v27 = vld [vmem:[%s2149_s27 + $0x65] sm:$0xff] }
  0xdf   : > { %v1795_v56 = vld [vmem:[%s2149_s27 + $0x9a] sm:$0xff] }
  0xe0   : > { %v1023_v30 = vpop.permute.xlu1 %1022  ;;  %v708_v31 = vpop.permute.xlu0 %707 }
  0xe1   : > { %1076 = vst.msk [vmem:[#allocation2 + $0x8] sm:$0xff] %vm1074_vm8, %v1023_v30  ;;  %v1859_v30 = vld [vmem:[%s2149_s27 + $0x6d] sm:$0xff] }
  0xe2   : > { %752 = vst.msk [vmem:[#allocation2 + $0x50] sm:$0xff] %vm741_vm5, %v708_v31  ;;  %1157 = vrot.lane.b32.xlu1 %v1881_v28, %s2083_s13  ;;  %1141 = vrot.lane.b32.xlu0 %v1873_v29, %s2083_s13  ;;  %v1867_v29 = vld [vmem:[%s2149_s27 + $0xad] sm:$0xff] }
  0xe4   : > { %v694_v32 = vpop.permute.xlu1 %693  ;;  %v1132_v33 = vpop.permute.xlu0 %1131 }
  0xe5   : > { %745 = vst.msk [vmem:[#allocation2 + $0x18] sm:$0xff] %vm741_vm5, %v694_v32 }
  0xe6   : > { %1186 = vst.msk [vmem:[#allocation2] sm:$0xff] %vm1185_vm9, %v1132_v33  ;;  %812 = vrot.lane.b32.xlu1 %v2438_v63, %s2080_s6  ;;  %497 = vrot.lane.b32.xlu0 %v2426_v59, %s2077_s29  ;;  %v1812_v59 = vld [vmem:[%s2149_s27 + $0x93] sm:$0xff]  ;;  %v1865_v63 = vld [vmem:[%s2149_s27 + $0x9d] sm:$0xff] }
  0xe8   : > { %v803_v35 = vpop.permute.xlu1 %802  ;;  %v710_v36 = vpop.permute.xlu0 %709 }
  0xe9   : > { %855 = vst.msk [vmem:[#allocation2 + $0x10] sm:$0xff] %vm852_vm6, %v803_v35  ;;  %v1876_v35 = vld [vmem:[%s2149_s27 + $0x66] sm:$0xff] }
  0xea   : > { %753 = vst.msk [vmem:[#allocation2 + $0x58] sm:$0xff] %vm741_vm5, %v710_v36  ;;  %921 = vrot.lane.b32.xlu1 %v2504_v34, %s2081_s7  ;;  %828 = vrot.lane.b32.xlu0 %v2435_v62, %s2080_s6 }
  0xec   : > { %v1134_v38 = vpop.permute.xlu1 %1133  ;;  %v819_v39 = vpop.permute.xlu0 %818 }
  0xed   : > { %v1204_v40 = vld [vmem:[#allocation2] sm:$0xff]  ;;  %1187 = vst.msk [vmem:[#allocation2 + $0x8] sm:$0xff] %vm1185_vm9, %v1134_v38  ;;  %v1885_v38 = vld [vmem:[%s2149_s27 + $0xae] sm:$0xff] }
  0xee   : > { %863 = vst.msk [vmem:[#allocation2 + $0x50] sm:$0xff] %vm852_vm6, %v819_v39  ;;  %1941 = vmatprep.mubr.msk.f32.mxu0 %vm1360_vm10, %v1204_v40  ;;  %499 = vrot.lane.b32.xlu1 %v2453_v5, %s2077_s29  ;;  %v1813_v5 = vld [vmem:[%s2149_s27 + $0x9b] sm:$0xff]  ;;  %v1877_v39 = vld [vmem:[%s2149_s27 + $0x6e] sm:$0xff] }
  0xef   : > { %937 = vrot.lane.b32.xlu0 %v2513_v37, %s2081_s7 }
  0xf0   : > { %v805_v42 = vpop.permute.xlu1 %804  ;;  %v490_v43 = vpop.permute.xlu0 %489 }
  0xf1   : > { %856 = vst.msk [vmem:[#allocation2 + $0x18] sm:$0xff] %vm852_vm6, %v805_v42  ;;  %v1228_v42 = vld [vmem:[%s2641_s25 + $0x8] sm:$0xff] }
  0xf2   : > { %532 = vst.msk [vmem:[#allocation2 + $0x60] sm:$0xff] %vm519_vm3, %v490_v43  ;;  %608 = vrot.lane.b32.xlu1 %v1794_v41, %s2078_s30  ;;  %v1227_v43 = vld [vmem:[%s2641_s25] sm:$0xff] }
  0xf3   : > { %592 = vrot.lane.b32.xlu0 %v2256_v46, %s2078_s30  ;;  %v1864_v46 = vld [vmem:[%s2149_s27 + $0x95] sm:$0xff] }
  0xf4   : > { %v914_v49 = vpop.permute.xlu1 %913  ;;  %v821_v50 = vpop.permute.xlu0 %820  ;;  %v1205_v51 = vld [vmem:[#allocation2 + $0x8] sm:$0xff] }
  0xf5   : > { %966 = vst.msk [vmem:[#allocation2 + $0x10] sm:$0xff] %vm963_vm7, %v914_v49  ;;  %1942 = vmatmul.mubr.msk.f32.vlgmr.msra.gmra.mrb[0].mxu0 %vm1360_vm10, %v1205_v51  ;;  %v1230_v49 = vld [vmem:[%s2641_s25 + $0x18] sm:$0xff] }
  0xf6   : > { %864 = vst.msk [vmem:[#allocation2 + $0x58] sm:$0xff] %vm852_vm6, %v821_v50  ;;  %939 = vrot.lane.b32.xlu1 %v2529_v47, %s2081_s7  ;;  %v1229_v50 = vld [vmem:[%s2641_s25 + $0x10] sm:$0xff] }
  0xf7   : > { %923 = vrot.lane.b32.xlu0 %v2532_v48, %s2081_s7 }
  0xf8   : > { %v492_v54 = vpop.permute.xlu1 %491  ;;  %v930_v55 = vpop.permute.xlu0 %929 }
  0xf9   : > { %533 = vst.msk [vmem:[#allocation2 + $0x68] sm:$0xff] %vm519_vm3, %v492_v54  ;;  %v1231_v54 = vld [vmem:[%s2641_s25 + $0x20] sm:$0xff] }
  0xfa   : > { %974 = vst.msk [vmem:[#allocation2 + $0x50] sm:$0xff] %vm963_vm7, %v930_v55  ;;  %1048 = vrot.lane.b32.xlu1 %v1864_v46, %s2082_s9 }
  0xfb   : > { %1032 = vrot.lane.b32.xlu0 %v1856_v53, %s2082_s9  ;;  %v1232_v53 = vld [vmem:[%s2641_s25 + $0x28] sm:$0xff] }
  0xfc   : > { %v601_v57 = vpop.permute.xlu1 %600  ;;  %v585_v58 = vpop.permute.xlu0 %584 }
  0xfd   : > { %643 = vst.msk [vmem:[#allocation2 + $0x60] sm:$0xff] %vm630_vm4, %v601_v57  ;;  %635 = vst.msk [vmem:[#allocation2 + $0x20] sm:$0xff] %vm630_vm4, %v585_v58  ;;  %v1234_v57 = vld [vmem:[%s2641_s25 + $0x38] sm:$0xff]  ;;  %v1233_v58 = vld [vmem:[%s2641_s25 + $0x30] sm:$0xff] }
  0xfe   : > { %610 = vrot.lane.b32.xlu1 %v1795_v56, %s2078_s30 }
  0xff   : > { %594 = vrot.lane.b32.xlu0 %v2273_v52, %s2078_s30  ;;  %s2757_s30 = scalar_lea.vmem %s2826_s4, %s1740_s22 }
 0x100   : > { %v932_v61 = vpop.permute.xlu1 %931  ;;  %v916_v62 = vpop.permute.xlu0 %915 }
 0x101   : > { %975 = vst.msk [vmem:[#allocation2 + $0x58] sm:$0xff] %vm963_vm7, %v932_v61  ;;  %967 = vst.msk [vmem:[#allocation2 + $0x18] sm:$0xff] %vm963_vm7, %v916_v62  ;;  %v1236_v61 = vld [vmem:[%s2641_s25 + $0x48] sm:$0xff]  ;;  %v1235_v62 = vld [vmem:[%s2641_s25 + $0x40] sm:$0xff] }
 0x102   : > { %719 = vrot.lane.b32.xlu1 %v1812_v59, %s2079_s5 }
 0x103   : > { %703 = vrot.lane.b32.xlu0 %v1804_v60, %s2079_s5 }
 0x104   : > { %v1041_v1 = vpop.permute.xlu1 %1040  ;;  %v1025_v52 = vpop.permute.xlu0 %1024 }
 0x105   : > { %1085 = vst.msk [vmem:[#allocation2 + $0x50] sm:$0xff] %vm1074_vm8, %v1041_v1  ;;  %1077 = vst.msk [vmem:[#allocation2 + $0x10] sm:$0xff] %vm1074_vm8, %v1025_v52  ;;  %v1238_v1 = vld [vmem:[%s2641_s25 + $0x58] sm:$0xff]  ;;  %v1237_v52 = vld [vmem:[%s2641_s25 + $0x50] sm:$0xff] }
 0x106   : > { %1050 = vrot.lane.b32.xlu1 %v1865_v63, %s2082_s9 }
 0x107   : > { %1034 = vrot.lane.b32.xlu0 %v1857_v0, %s2082_s9 }
 0x108   : > { %v603_v3 = vpop.permute.xlu1 %602  ;;  %v587_v4 = vpop.permute.xlu0 %586 }
 0x109   : > { %644 = vst.msk [vmem:[#allocation2 + $0x68] sm:$0xff] %vm630_vm4, %v603_v3  ;;  %636 = vst.msk [vmem:[#allocation2 + $0x28] sm:$0xff] %vm630_vm4, %v587_v4  ;;  %v1240_v3 = vld [vmem:[%s2641_s25 + $0x68] sm:$0xff]  ;;  %v1239_v4 = vld [vmem:[%s2641_s25 + $0x60] sm:$0xff] }
 0x10a   : > { %1159 = vrot.lane.b32.xlu1 %v1882_v45, %s2083_s13 }
 0x10b   : > { %1143 = vrot.lane.b32.xlu0 %v1874_v2, %s2083_s13 }
 0x10c   : > { %v712_v8 = vpop.permute.xlu1 %711  ;;  %v696_v10 = vpop.permute.xlu0 %695 }
 0x10d   : > { %754 = vst.msk [vmem:[#allocation2 + $0x60] sm:$0xff] %vm741_vm5, %v712_v8  ;;  %746 = vst.msk [vmem:[#allocation2 + $0x20] sm:$0xff] %vm741_vm5, %v696_v10  ;;  %v1241_v8 = vld [vmem:[%s2641_s25 + $0x70] sm:$0xff]  ;;  %v1242_v10 = vld [vmem:[%s2641_s25 + $0x78] sm:$0xff] }
 0x10e   : > { %721 = vrot.lane.b32.xlu1 %v1813_v5, %s2079_s5 }
 0x10f   : > { %705 = vrot.lane.b32.xlu0 %v1805_v6, %s2079_s5 }
 0x110   : > { %v1043_v11 = vpop.permute.xlu1 %1042  ;;  %v1027_v12 = vpop.permute.xlu0 %1026 }
 0x111   : > { %1086 = vst.msk [vmem:[#allocation2 + $0x58] sm:$0xff] %vm1074_vm8, %v1043_v11  ;;  %1078 = vst.msk [vmem:[#allocation2 + $0x18] sm:$0xff] %vm1074_vm8, %v1027_v12 }
 0x112   : > { %830 = vrot.lane.b32.xlu1 %v2513_v37, %s2080_s6 }
 0x113   : > { %814 = vrot.lane.b32.xlu0 %v2504_v34, %s2080_s6  ;;  %v1884_v34 = vld [vmem:[%s2149_s27 + $0xa6] sm:$0xff] }
 0x114   : > { %v1152_v15 = vpop.permute.xlu1 %1151  ;;  %v1136_v16 = vpop.permute.xlu0 %1135 }
 0x115   : > { %1196 = vst.msk [vmem:[#allocation2 + $0x50] sm:$0xff] %vm1185_vm9, %v1152_v15  ;;  %1188 = vst.msk [vmem:[#allocation2 + $0x10] sm:$0xff] %vm1185_vm9, %v1136_v16  ;;  %v1243_v15 = vld [vmem:[%s2641_s25 + $0x80] sm:$0xff]  ;;  %v1244_v16 = vld [vmem:[%s2641_s25 + $0x88] sm:$0xff] }
 0x116   : > { %1161 = vrot.lane.b32.xlu1 %v1883_v13, %s2083_s13 }
 0x117   : > { %1145 = vrot.lane.b32.xlu0 %v1875_v14, %s2083_s13 }
 0x118   : > { %v714_v17 = vpop.permute.xlu1 %713  ;;  %v698_v44 = vpop.permute.xlu0 %697 }
 0x119   : > { %755 = vst.msk [vmem:[#allocation2 + $0x68] sm:$0xff] %vm741_vm5, %v714_v17  ;;  %747 = vst.msk [vmem:[#allocation2 + $0x28] sm:$0xff] %vm741_vm5, %v698_v44 }
 0x11a   : > { %832 = vrot.lane.b32.xlu1 %v2529_v47, %s2080_s6 }
 0x11b   : > { %816 = vrot.lane.b32.xlu0 %v2532_v48, %s2080_s6 }
 0x11c   : > { %v823_v19 = vpop.permute.xlu1 %822  ;;  %v807_v20 = vpop.permute.xlu0 %806  ;;  %v1206_v21 = vld [vmem:[#allocation2 + $0x10] sm:$0xff] }
 0x11d   : > { %v1214_v22 = vld [vmem:[#allocation2 + $0x50] sm:$0xff]  ;;  %865 = vst.msk [vmem:[#allocation2 + $0x60] sm:$0xff] %vm852_vm6, %v823_v19  ;;  %857 = vst.msk [vmem:[#allocation2 + $0x20] sm:$0xff] %vm852_vm6, %v807_v20  ;;  %1944 = vmatprep.mubr.msk.f32.mxu0 %vm1360_vm10, %v1206_v21 }
 0x11e   : > { %1956 = vmatprep.mubr.msk.f32.mxu1 %vm1360_vm10, %v1214_v22  ;;  %941 = vrot.lane.b32.xlu1 %v1848_v18, %s2081_s7 }
 0x11f   : > { %925 = vrot.lane.b32.xlu0 %v2306_v7, %s2081_s7 }
 0x120   : > { %v1154_v24 = vpop.permute.xlu1 %1153  ;;  %v1138_v25 = vpop.permute.xlu0 %1137 }
 0x121   : > { %1197 = vst.msk [vmem:[#allocation2 + $0x58] sm:$0xff] %vm1185_vm9, %v1154_v24  ;;  %1189 = vst.msk [vmem:[#allocation2 + $0x18] sm:$0xff] %vm1185_vm9, %v1138_v25 }
 0x122   : > { %943 = vrot.lane.b32.xlu1 %v1849_v23, %s2081_s7 }
 0x123   : > { %927 = vrot.lane.b32.xlu0 %v2317_v9, %s2081_s7 }
 0x124   : > { %v809_v28 = vpop.permute.xlu1 %808  ;;  %v494_v7 = vpop.permute.xlu0 %493 }
 0x125   : > { %858 = vst.msk [vmem:[#allocation2 + $0x28] sm:$0xff] %vm852_vm6, %v809_v28 }
 0x126   : > { %534 = vst.msk [vmem:[#allocation2 + $0x70] sm:$0xff] %vm519_vm3, %v494_v7  ;;  %1052 = vrot.lane.b32.xlu1 %v1866_v26, %s2082_s9 }
 0x127   : > { %1036 = vrot.lane.b32.xlu0 %v1858_v27, %s2082_s9 }
 0x128   : > { %v918_v31 = vpop.permute.xlu1 %917  ;;  %v825_v9 = vpop.permute.xlu0 %824  ;;  %v1207_v32 = vld [vmem:[#allocation2 + $0x18] sm:$0xff] }
 0x129   : > { %v1215_v33 = vld [vmem:[#allocation2 + $0x58] sm:$0xff]  ;;  %968 = vst.msk [vmem:[#allocation2 + $0x20] sm:$0xff] %vm963_vm7, %v918_v31  ;;  %1945 = vmatmul.mubr.msk.f32.gmra.mrb[2].mxu0 %vm1360_vm10, %v1207_v32 }
 0x12a   : > { %866 = vst.msk [vmem:[#allocation2 + $0x68] sm:$0xff] %vm852_vm6, %v825_v9  ;;  %1957 = vmatmul.mubr.msk.f32.vlgmr.msra.gmra.mrb[0].mxu1 %vm1360_vm10, %v1215_v33  ;;  %1054 = vrot.lane.b32.xlu1 %v1867_v29, %s2082_s9 }
 0x12b   : > { %1038 = vrot.lane.b32.xlu0 %v1859_v30, %s2082_s9 }
 0x12c   : > { %v496_v36 = vpop.permute.xlu1 %495  ;;  %v934_v37 = vpop.permute.xlu0 %933 }
 0x12d   : > { %535 = vst.msk [vmem:[#allocation2 + $0x78] sm:$0xff] %vm519_vm3, %v496_v36 }
 0x12e   : > { %976 = vst.msk [vmem:[#allocation2 + $0x60] sm:$0xff] %vm963_vm7, %v934_v37  ;;  %1163 = vrot.lane.b32.xlu1 %v1884_v34, %s2083_s13 }
 0x12f   : > { %1147 = vrot.lane.b32.xlu0 %v1876_v35, %s2083_s13 }
 0x130   : > { %v605_v40 = vpop.permute.xlu1 %604  ;;  %v589_v41 = vpop.permute.xlu0 %588 }
 0x131   : > { %645 = vst.msk [vmem:[#allocation2 + $0x70] sm:$0xff] %vm630_vm4, %v605_v40  ;;  %637 = vst.msk [vmem:[#allocation2 + $0x30] sm:$0xff] %vm630_vm4, %v589_v41 }
 0x132   : > { %1165 = vrot.lane.b32.xlu1 %v1885_v38, %s2083_s13 }
 0x133   : > { %1149 = vrot.lane.b32.xlu0 %v1877_v39, %s2083_s13 }
 0x134   : > { %v936_v47 = vpop.permute.xlu1 %935  ;;  %v920_v48 = vpop.permute.xlu0 %919 }
 0x135   : > { %977 = vst.msk [vmem:[#allocation2 + $0x68] sm:$0xff] %vm963_vm7, %v936_v47  ;;  %969 = vst.msk [vmem:[#allocation2 + $0x28] sm:$0xff] %vm963_vm7, %v920_v48 }
 0x136   : > { %1253 = vperm.xlu1 %2035, %v1228_v42  }
 0x137   : > { %1248 = vperm.xlu0 %2034, %v1227_v43  }
 0x138   : > { %v1045_v51 = vpop.permute.xlu1 %1044  ;;  %v1029_v46 = vpop.permute.xlu0 %1028 }
 0x139   : > { %1087 = vst.msk [vmem:[#allocation2 + $0x60] sm:$0xff] %vm1074_vm8, %v1045_v51  ;;  %1079 = vst.msk [vmem:[#allocation2 + $0x20] sm:$0xff] %vm1074_vm8, %v1029_v46 }
 0x13a   : > { %1258 = vperm.xlu1 %2035, %v1229_v50  }
 0x13b   : > { %1263 = vperm.xlu0 %2034, %v1230_v49  }
 0x13c   : > { %v607_v55 = vpop.permute.xlu1 %606  ;;  %v591_v56 = vpop.permute.xlu0 %590 }
 0x13d   : > { %646 = vst.msk [vmem:[#allocation2 + $0x78] sm:$0xff] %vm630_vm4, %v607_v55  ;;  %638 = vst.msk [vmem:[#allocation2 + $0x38] sm:$0xff] %vm630_vm4, %v591_v56 }
 0x13e   : > { %1268 = vperm.xlu1 %2035, %v1231_v54  }
 0x13f   : > { %1273 = vperm.xlu0 %2034, %v1232_v53  }
 0x140   : > { %v716_v59 = vpop.permute.xlu1 %715  ;;  %v700_v60 = vpop.permute.xlu0 %699 }
 0x141   : > { %756 = vst.msk [vmem:[#allocation2 + $0x70] sm:$0xff] %vm741_vm5, %v716_v59  ;;  %748 = vst.msk [vmem:[#allocation2 + $0x30] sm:$0xff] %vm741_vm5, %v700_v60 }
 0x142   : > { %1278 = vperm.xlu1 %2035, %v1233_v58  }
 0x143   : > { %1283 = vperm.xlu0 %2034, %v1234_v57  }
 0x144   : > { %v1047_v63 = vpop.permute.xlu1 %1046  ;;  %v1031_v0 = vpop.permute.xlu0 %1030 }
 0x145   : > { %1088 = vst.msk [vmem:[#allocation2 + $0x68] sm:$0xff] %vm1074_vm8, %v1047_v63  ;;  %1080 = vst.msk [vmem:[#allocation2 + $0x28] sm:$0xff] %vm1074_vm8, %v1031_v0 }
 0x146   : > { %1288 = vperm.xlu1 %2035, %v1235_v62  }
 0x147   : > { %1293 = vperm.xlu0 %2034, %v1236_v61  }
 0x148   : > { %v1156_v45 = vpop.permute.xlu1 %1155  ;;  %v1140_v2 = vpop.permute.xlu0 %1139 }
 0x149   : > { %1198 = vst.msk [vmem:[#allocation2 + $0x60] sm:$0xff] %vm1185_vm9, %v1156_v45  ;;  %1190 = vst.msk [vmem:[#allocation2 + $0x20] sm:$0xff] %vm1185_vm9, %v1140_v2 }
 0x14a   : > { %1298 = vperm.xlu1 %2035, %v1237_v52  }
 0x14b   : > { %1303 = vperm.xlu0 %2034, %v1238_v1  }
 0x14c   : > { %v718_v5 = vpop.permute.xlu1 %717  ;;  %v702_v6 = vpop.permute.xlu0 %701 }
 0x14d   : > { %757 = vst.msk [vmem:[#allocation2 + $0x78] sm:$0xff] %vm741_vm5, %v718_v5  ;;  %749 = vst.msk [vmem:[#allocation2 + $0x38] sm:$0xff] %vm741_vm5, %v702_v6 }
 0x14e   : > { %1308 = vperm.xlu1 %2035, %v1239_v4  }
 0x14f   : > { %1313 = vperm.xlu0 %2034, %v1240_v3  }
 0x150   : > { %v827_v11 = vpop.permute.xlu1 %826  ;;  %v811_v12 = vpop.permute.xlu0 %810  ;;  %v1208_v13 = vld [vmem:[#allocation2 + $0x20] sm:$0xff] }
 0x151   : > { %v1216_v14 = vld [vmem:[#allocation2 + $0x60] sm:$0xff]  ;;  %867 = vst.msk [vmem:[#allocation2 + $0x70] sm:$0xff] %vm852_vm6, %v827_v11  ;;  %859 = vst.msk [vmem:[#allocation2 + $0x30] sm:$0xff] %vm852_vm6, %v811_v12  ;;  %1947 = vmatprep.mubr.msk.f32.mxu0 %vm1360_vm10, %v1208_v13 }
 0x152   : > { %1959 = vmatprep.mubr.msk.f32.mxu1 %vm1360_vm10, %v1216_v14  ;;  %1318 = vperm.xlu1 %2035, %v1241_v8   ;;  %v2738_v8 = vld [vmem:[%s2824_s2] ss:$0 sm:$0xff] }
 0x153   : > { %1323 = vperm.xlu0 %2034, %v1242_v10  }
 0x154   : > { %v1158_v17 = vpop.permute.xlu1 %1157  ;;  %v1142_v44 = vpop.permute.xlu0 %1141 }
 0x155   : > { %1199 = vst.msk [vmem:[#allocation2 + $0x68] sm:$0xff] %vm1185_vm9, %v1158_v17  ;;  %1191 = vst.msk [vmem:[#allocation2 + $0x28] sm:$0xff] %vm1185_vm9, %v1142_v44 }
 0x156   : > { %1328 = vperm.xlu1 %2035, %v1243_v15  }
 0x157   : > { %1333 = vperm.xlu0 %2034, %v1244_v16  }
 0x158   : > { %v813_v18 = vpop.permute.xlu1 %812  ;;  %v498_v19 = vpop.permute.xlu0 %497 }
 0x159   : > { %860 = vst.msk [vmem:[#allocation2 + $0x38] sm:$0xff] %vm852_vm6, %v813_v18 }
 0x15a   : > { %536 = vst.msk [vmem:[#allocation2 + $0x80] sm:$0xff] %vm519_vm3, %v498_v19 }
 0x15c   : > { %v922_v20 = vpop.permute.xlu1 %921  ;;  %v829_v21 = vpop.permute.xlu0 %828  ;;  %v1209_v22 = vld [vmem:[#allocation2 + $0x28] sm:$0xff] }
 0x15d   : > { %v1217_v23 = vld [vmem:[#allocation2 + $0x68] sm:$0xff]  ;;  %970 = vst.msk [vmem:[#allocation2 + $0x30] sm:$0xff] %vm963_vm7, %v922_v20  ;;  %1948 = vmatmul.mubr.msk.f32.gmra.mrb[4].mxu0 %vm1360_vm10, %v1209_v22 }
 0x15e   : > { %868 = vst.msk [vmem:[#allocation2 + $0x78] sm:$0xff] %vm852_vm6, %v829_v21  ;;  %1960 = vmatmul.mubr.msk.f32.gmra.mrb[2].mxu1 %vm1360_vm10, %v1217_v23 }
 0x160   : > { %v500_v24 = vpop.permute.xlu1 %499 }
 0x161   : > { %v938_v25 = vpop.permute.xlu0 %937  ;;  %537 = vst.msk [vmem:[#allocation2 + $0x88] sm:$0xff] %vm519_vm3, %v500_v24 }
 0x162   : > { %978 = vst.msk [vmem:[#allocation2 + $0x70] sm:$0xff] %vm963_vm7, %v938_v25 }
 0x164   : > { %v609_v26 = vpop.permute.xlu1 %608 }
 0x165   : > { %v593_v27 = vpop.permute.xlu0 %592  ;;  %647 = vst.msk [vmem:[#allocation2 + $0x80] sm:$0xff] %vm630_vm4, %v609_v26 }
 0x166   : > { %639 = vst.msk [vmem:[#allocation2 + $0x40] sm:$0xff] %vm630_vm4, %v593_v27 }
 0x168   : > { %v940_v28 = vpop.permute.xlu1 %939 }
 0x169   : > { %v924_v7 = vpop.permute.xlu0 %923  ;;  %979 = vst.msk [vmem:[#allocation2 + $0x78] sm:$0xff] %vm963_vm7, %v940_v28 }
 0x16a   : > { %971 = vst.msk [vmem:[#allocation2 + $0x38] sm:$0xff] %vm963_vm7, %v924_v7 }
 0x16c   : > { %v1049_v29 = vpop.permute.xlu1 %1048 }
 0x16d   : > { %v1033_v30 = vpop.permute.xlu0 %1032  ;;  %1089 = vst.msk [vmem:[#allocation2 + $0x70] sm:$0xff] %vm1074_vm8, %v1049_v29 }
 0x16e   : > { %1081 = vst.msk [vmem:[#allocation2 + $0x30] sm:$0xff] %vm1074_vm8, %v1033_v30 }
 0x170   : > { %v611_v31 = vpop.permute.xlu1 %610 }
 0x171   : > { %v595_v9 = vpop.permute.xlu0 %594  ;;  %648 = vst.msk [vmem:[#allocation2 + $0x88] sm:$0xff] %vm630_vm4, %v611_v31 }
 0x172   : > { %640 = vst.msk [vmem:[#allocation2 + $0x48] sm:$0xff] %vm630_vm4, %v595_v9 }
 0x174   : > { %v720_v32 = vpop.permute.xlu1 %719 }
 0x175   : > { %v704_v33 = vpop.permute.xlu0 %703  ;;  %758 = vst.msk [vmem:[#allocation2 + $0x80] sm:$0xff] %vm741_vm5, %v720_v32 }
 0x176   : > { %750 = vst.msk [vmem:[#allocation2 + $0x40] sm:$0xff] %vm741_vm5, %v704_v33 }
 0x178   : > { %v1051_v34 = vpop.permute.xlu1 %1050 }
 0x179   : > { %v1035_v35 = vpop.permute.xlu0 %1034  ;;  %1090 = vst.msk [vmem:[#allocation2 + $0x78] sm:$0xff] %vm1074_vm8, %v1051_v34 }
 0x17a   : > { %1082 = vst.msk [vmem:[#allocation2 + $0x38] sm:$0xff] %vm1074_vm8, %v1035_v35 }
 0x17c   : > { %v1160_v36 = vpop.permute.xlu1 %1159 }
 0x17d   : > { %v1144_v37 = vpop.permute.xlu0 %1143  ;;  %1200 = vst.msk [vmem:[#allocation2 + $0x70] sm:$0xff] %vm1185_vm9, %v1160_v36 }
 0x17e   : > { %1192 = vst.msk [vmem:[#allocation2 + $0x30] sm:$0xff] %vm1185_vm9, %v1144_v37 }
 0x180   : > { %v722_v38 = vpop.permute.xlu1 %721 }
 0x181   : > { %v706_v39 = vpop.permute.xlu0 %705  ;;  %759 = vst.msk [vmem:[#allocation2 + $0x88] sm:$0xff] %vm741_vm5, %v722_v38 }
 0x182   : > { %751 = vst.msk [vmem:[#allocation2 + $0x48] sm:$0xff] %vm741_vm5, %v706_v39 }
 0x184   : > { %v831_v40 = vpop.permute.xlu1 %830  ;;  %v1218_v43 = vld [vmem:[#allocation2 + $0x70] sm:$0xff] }
 0x185   : > { %v815_v41 = vpop.permute.xlu0 %814  ;;  %v1210_v42 = vld [vmem:[#allocation2 + $0x30] sm:$0xff]  ;;  %869 = vst.msk [vmem:[#allocation2 + $0x80] sm:$0xff] %vm852_vm6, %v831_v40  ;;  %1962 = vmatprep.mubr.msk.f32.mxu1 %vm1360_vm10, %v1218_v43 }
 0x186   : > { %861 = vst.msk [vmem:[#allocation2 + $0x40] sm:$0xff] %vm852_vm6, %v815_v41  ;;  %1950 = vmatprep.mubr.msk.f32.mxu0 %vm1360_vm10, %v1210_v42 }
 0x188   : > { %v1162_v47 = vpop.permute.xlu1 %1161 }
 0x189   : > { %v1146_v48 = vpop.permute.xlu0 %1145  ;;  %1201 = vst.msk [vmem:[#allocation2 + $0x78] sm:$0xff] %vm1185_vm9, %v1162_v47 }
 0x18a   : > { %1193 = vst.msk [vmem:[#allocation2 + $0x38] sm:$0xff] %vm1185_vm9, %v1146_v48 }
 0x18c   : > { %v833_v49 = vpop.permute.xlu1 %832 }
 0x18d   : > { %v817_v50 = vpop.permute.xlu0 %816  ;;  %870 = vst.msk [vmem:[#allocation2 + $0x88] sm:$0xff] %vm852_vm6, %v833_v49 }
 0x18e   : > { %862 = vst.msk [vmem:[#allocation2 + $0x48] sm:$0xff] %vm852_vm6, %v817_v50 }
 0x190   : > { %v942_v51 = vpop.permute.xlu1 %941  ;;  %v1219_v54 = vld [vmem:[#allocation2 + $0x78] sm:$0xff] }
 0x191   : > { %v926_v46 = vpop.permute.xlu0 %925  ;;  %v1211_v53 = vld [vmem:[#allocation2 + $0x38] sm:$0xff]  ;;  %980 = vst.msk [vmem:[#allocation2 + $0x80] sm:$0xff] %vm963_vm7, %v942_v51  ;;  %1963 = vmatmul.mubr.msk.f32.gmra.mrb[4].mxu1 %vm1360_vm10, %v1219_v54 }
 0x192   : > { %972 = vst.msk [vmem:[#allocation2 + $0x40] sm:$0xff] %vm963_vm7, %v926_v46  ;;  %1951 = vmatmul.mubr.msk.f32.gmra.mrb[6].mxu0 %vm1360_vm10, %v1211_v53 }
 0x194   : > { %v944_v55 = vpop.permute.xlu1 %943 }
 0x195   : > { %v928_v56 = vpop.permute.xlu0 %927  ;;  %981 = vst.msk [vmem:[#allocation2 + $0x88] sm:$0xff] %vm963_vm7, %v944_v55 }
 0x196   : > { %973 = vst.msk [vmem:[#allocation2 + $0x48] sm:$0xff] %vm963_vm7, %v928_v56 }
 0x198   : > { %v1053_v57 = vpop.permute.xlu1 %1052 }
 0x199   : > { %v1037_v58 = vpop.permute.xlu0 %1036  ;;  %1091 = vst.msk [vmem:[#allocation2 + $0x80] sm:$0xff] %vm1074_vm8, %v1053_v57 }
 0x19a   : > { %1083 = vst.msk [vmem:[#allocation2 + $0x40] sm:$0xff] %vm1074_vm8, %v1037_v58 }
 0x19c   : > { %v1055_v59 = vpop.permute.xlu1 %1054 }
 0x19d   : > { %v1039_v60 = vpop.permute.xlu0 %1038  ;;  %1092 = vst.msk [vmem:[#allocation2 + $0x88] sm:$0xff] %vm1074_vm8, %v1055_v59 }
 0x19e   : > { %1084 = vst.msk [vmem:[#allocation2 + $0x48] sm:$0xff] %vm1074_vm8, %v1039_v60 }
 0x1a0   : > { %v1164_v61 = vpop.permute.xlu1 %1163 }
 0x1a1   : > { %v1148_v62 = vpop.permute.xlu0 %1147  ;;  %1202 = vst.msk [vmem:[#allocation2 + $0x80] sm:$0xff] %vm1185_vm9, %v1164_v61 }
 0x1a2   : > { %1194 = vst.msk [vmem:[#allocation2 + $0x40] sm:$0xff] %vm1185_vm9, %v1148_v62 }
 0x1a4   : > { %v1166_v63 = vpop.permute.xlu1 %1165 }
 0x1a5   : > { %v1150_v0 = vpop.permute.xlu0 %1149  ;;  %1203 = vst.msk [vmem:[#allocation2 + $0x88] sm:$0xff] %vm1185_vm9, %v1166_v63 }
 0x1a6   : > { %1195 = vst.msk [vmem:[#allocation2 + $0x48] sm:$0xff] %vm1185_vm9, %v1150_v0 }
 0x1a8   : > { %v1220_v52 = vld [vmem:[#allocation2 + $0x80] sm:$0xff] }
 0x1a9   : > { %v1212_v1 = vld [vmem:[#allocation2 + $0x40] sm:$0xff]  ;;  %1965 = vmatprep.mubr.msk.f32.mxu1 %vm1360_vm10, %v1220_v52 }
 0x1aa   : > { %1953 = vmatprep.mubr.msk.f32.mxu0 %vm1360_vm10, %v1212_v1 }
 0x1ac   : > { %v1221_v2 = vld [vmem:[#allocation2 + $0x88] sm:$0xff] }
 0x1ad   : > { %v1213_v45 = vld [vmem:[#allocation2 + $0x48] sm:$0xff]  ;;  %1966 = vmatmul.mubr.msk.f32.gmra.mrb[6].mxu1 %vm1360_vm10, %v1221_v2 }
 0x1ae   : > { %1954 = vmatmul.mubr.msk.f32.gmra.mrb[8].mxu0 %vm1360_vm10, %v1213_v45 }
 0x1b5   : > { %v1254_v3 = vpop.permute.xlu1 %1253 }
 0x1b6   : > { %v1249_v4 = vpop.permute.xlu0 %1248  ;;  %v1343_v44 = vmul.f32 %v2738_v8, %v1254_v3 }
 0x1b7   : > { %v1342_v20 = vmul.f32 %v2738_v8, %v1249_v4 }
 0x1b9   : > { %v1259_v6 = vpop.permute.xlu1 %1258 }
 0x1ba   : > { %v1264_v5 = vpop.permute.xlu0 %1263  ;;  %v1344_v30 = vmul.f32 %v2738_v8, %v1259_v6 }
 0x1bb   : > { %v1345_v7 = vmul.f32 %v2738_v8, %v1264_v5 }
 0x1bd   : > { %v1269_v11 = vpop.permute.xlu1 %1268 }
 0x1be   : > { %v1274_v10 = vpop.permute.xlu0 %1273  ;;  %v1346_v13 = vmul.f32 %v2738_v8, %v1269_v11 }
 0x1bf   : > { %v1347_v12 = vmul.f32 %v2738_v8, %v1274_v10 }
 0x1c1   : > { %v1279_v15 = vpop.permute.xlu1 %1278 }
 0x1c2   : > { %v1284_v14 = vpop.permute.xlu0 %1283  ;;  %v1348_v17 = vmul.f32 %v2738_v8, %v1279_v15 }
 0x1c3   : > { %v1349_v16 = vmul.f32 %v2738_v8, %v1284_v14 }
 0x1c5   : > { %v1289_v19 = vpop.permute.xlu1 %1288 }
 0x1c6   : > { %v1294_v18 = vpop.permute.xlu0 %1293  ;;  %v2750_v22 = vmul.f32 %v2738_v8, %v1289_v19 }
 0x1c7   : > { %v2747_v21 = vmul.f32 %v2738_v8, %v1294_v18 }
 0x1c8   : > { %v1943_v23 = vpop.f32.mrb[0].mxu0 }
 0x1c9   : > { %v1491_v24 = vadd.f32 %v1943_v23, %v1343_v44  ;;  %v1485_v25 = vpop.f32.mrb[1].mxu0  ;;  %v1299_v28 = vpop.permute.xlu1 %1298 }
 0x1ca   : > { %v1486_v26 = vadd.f32 %v1485_v25, %v1342_v20  ;;  %v1304_v27 = vpop.permute.xlu0 %1303  ;;  %v1352_v31 = vmul.f32 %v2738_v8, %v1299_v28 }
 0x1cb   : > { %1576 = vst.msk [vmem:[%s2757_s30 + $0x8] sm:$0xff] %vm1574_vm11, %v1491_v24  ;;  %v1353_v29 = vmul.f32 %v2738_v8, %v1304_v27 }
 0x1cc   : > { %1575 = vst.msk [vmem:[%s2757_s30] sm:$0xff] %vm1574_vm11, %v1486_v26 }
 0x1cd   : > { %v1309_v40 = vpop.permute.xlu1 %1308 }
 0x1ce   : > { %v1314_v39 = vpop.permute.xlu0 %1313  ;;  %v1354_v42 = vmul.f32 %v2738_v8, %v1309_v40 }
 0x1cf   : > { %v1355_v41 = vmul.f32 %v2738_v8, %v1314_v39 }
 0x1d1   : > { %v1319_v55 = vpop.permute.xlu1 %1318 }
 0x1d2   : > { %v1324_v54 = vpop.permute.xlu0 %1323  ;;  %v1356_v57 = vmul.f32 %v2738_v8, %v1319_v55 }
 0x1d3   : > { %v1357_v56 = vmul.f32 %v2738_v8, %v1324_v54 }
 0x1d5   : > { %v1329_v45 = vpop.permute.xlu1 %1328 }
 0x1d6   : > { %v1334_v52 = vpop.permute.xlu0 %1333  ;;  %v1358_v3 = vmul.f32 %v2738_v8, %v1329_v45 }
 0x1d7   : > { %v1359_v2 = vmul.f32 %v2738_v8, %v1334_v52 }
 0x1fc   : > { %v1946_v9 = vpop.f32.mrb[2].mxu0 }
 0x1fd   : > { %v1958_v32 = vpop.f32.mrb[0].mxu1  ;;  %v1501_v33 = vadd.f32 %v1946_v9, %v1345_v7  ;;  %v1495_v35 = vpop.f32.mrb[3].mxu0 }
 0x1fe   : > { %v1541_v34 = vadd.f32 %v1958_v32, %v1353_v29  ;;  %v1535_v36 = vpop.f32.mrb[1].mxu1  ;;  %v1496_v37 = vadd.f32 %v1495_v35, %v1344_v30 }
 0x1ff   : > { %v1536_v38 = vadd.f32 %v1535_v36, %v1352_v31  ;;  %1578 = vst.msk [vmem:[%s2757_s30 + $0x18] sm:$0xff] %vm1574_vm11, %v1501_v33 }
 0x200   : > { %1586 = vst.msk [vmem:[%s2757_s30 + $0x58] sm:$0xff] %vm1574_vm11, %v1541_v34  ;;  %1577 = vst.msk [vmem:[%s2757_s30 + $0x10] sm:$0xff] %vm1574_vm11, %v1496_v37 }
 0x201   : > { %1585 = vst.msk [vmem:[%s2757_s30 + $0x50] sm:$0xff] %vm1574_vm11, %v1536_v38 }
 0x230   : > { %v1949_v43 = vpop.f32.mrb[4].mxu0 }
 0x231   : > { %v1961_v47 = vpop.f32.mrb[2].mxu1  ;;  %v1511_v48 = vadd.f32 %v1949_v43, %v1347_v12  ;;  %v1505_v50 = vpop.f32.mrb[5].mxu0 }
 0x232   : > { %v1551_v49 = vadd.f32 %v1961_v47, %v1355_v41  ;;  %v1545_v51 = vpop.f32.mrb[3].mxu1  ;;  %v1506_v46 = vadd.f32 %v1505_v50, %v1346_v13 }
 0x233   : > { %v1546_v53 = vadd.f32 %v1545_v51, %v1354_v42  ;;  %1580 = vst.msk [vmem:[%s2757_s30 + $0x28] sm:$0xff] %vm1574_vm11, %v1511_v48 }
 0x234   : > { %1588 = vst.msk [vmem:[%s2757_s30 + $0x68] sm:$0xff] %vm1574_vm11, %v1551_v49  ;;  %1579 = vst.msk [vmem:[%s2757_s30 + $0x20] sm:$0xff] %vm1574_vm11, %v1506_v46 }
 0x235   : > { %1587 = vst.msk [vmem:[%s2757_s30 + $0x60] sm:$0xff] %vm1574_vm11, %v1546_v53 }
 0x264   : > { %v1964_v59 = vpop.f32.mrb[4].mxu1 }
 0x265   : > { %v1952_v58 = vpop.f32.mrb[6].mxu0  ;;  %v1561_v61 = vadd.f32 %v1964_v59, %v1357_v56  ;;  %v1555_v63 = vpop.f32.mrb[5].mxu1 }
 0x266   : > { %v1521_v60 = vadd.f32 %v1952_v58, %v1349_v16  ;;  %v1515_v62 = vpop.f32.mrb[7].mxu0  ;;  %v1556_v1 = vadd.f32 %v1555_v63, %v1356_v57 }
 0x267   : > { %v1516_v0 = vadd.f32 %v1515_v62, %v1348_v17  ;;  %1590 = vst.msk [vmem:[%s2757_s30 + $0x78] sm:$0xff] %vm1574_vm11, %v1561_v61 }
 0x268   : > { %1582 = vst.msk [vmem:[%s2757_s30 + $0x38] sm:$0xff] %vm1574_vm11, %v1521_v60  ;;  %1589 = vst.msk [vmem:[%s2757_s30 + $0x70] sm:$0xff] %vm1574_vm11, %v1556_v1 }
 0x269   : > { %1581 = vst.msk [vmem:[%s2757_s30 + $0x30] sm:$0xff] %vm1574_vm11, %v1516_v0 }
 0x280   : > { %v1967_v5 = vpop.f32.mrb[6].mxu1 }
 0x281   : > { %v1955_v4 = vpop.f32.mrb[8].mxu0  ;;  %v1571_v10 = vadd.f32 %v1967_v5, %v1359_v2  ;;  %v1565_v12 = vpop.f32.mrb[7].mxu1 }
 0x282   : > { %v1531_v6 = vadd.f32 %v1955_v4, %v2747_v21  ;;  %v1525_v11 = vpop.f32.mrb[9].mxu0  ;;  %v1566_v14 = vadd.f32 %v1565_v12, %v1358_v3 }
 0x283   : > { %v1526_v13 = vadd.f32 %v1525_v11, %v2750_v22  ;;  %1592 = vst.msk [vmem:[%s2757_s30 + $0x88] sm:$0xff] %vm1574_vm11, %v1571_v10 }
 0x284   : > { %1584 = vst.msk [vmem:[%s2757_s30 + $0x48] sm:$0xff] %vm1574_vm11, %v1531_v6  ;;  %1591 = vst.msk [vmem:[%s2757_s30 + $0x80] sm:$0xff] %vm1574_vm11, %v1566_v14 }
 0x285   : > { %1583 = vst.msk [vmem:[%s2757_s30 + $0x40] sm:$0xff] %vm1574_vm11, %v1526_v13 }
 0x286 PF: > { %s14_s19 = sadd.s32 1, %s2074_s19   ;;  %s2827_s15 = smov %s2066_s17 }
 0x287   : > { %p11_p7 = scmp.ge.s32.totalorder %s14_s19, 6   ;;  %s2828_s16 = smov %s2070_s18 }
 0x288   : > { %s2829_s17 = smov %s2832_s20  ;;  %s2830_s18 = smov %s2836_s21 }
 0x289   :  { %13 = sbr.rel (!%p11_p7) target bundleno = 3 (0x3), region = 81 }

</bundles_post_ra>
